<compile_context>
chip_gen: v7x
topology: tpu7x:2x2x1
jax: 0.10.0
libtpu: 0.0.40
codegen_flags: <defaults>
</compile_context>

<pallas_src>
import jax
import jax.numpy as jnp
from jax.experimental import pallas as pl
from jax.experimental.pallas import tpu as pltpu

NUM_LAYERS = 8
HIDDEN = 128                  # small stand-in for the module default (512)
NUM_INTER = NUM_LAYERS - 2    # 6 intermediate layers
SKIP = NUM_INTER // 2         # = 3: concat coords after this intermediate layer


def _round_up(x, m):
    return (x + m - 1) // m * m


def _choose_tile(n, tm_req):
    """Largest lane tile (multiple of 128) <= tm_req that keeps grid >= 2."""
    n128 = max(128, _round_up(n, 128))
    tm = max(128, min(_round_up(tm_req, 128), n128))
    while tm > 128 and _round_up(n128, tm) // tm < 2:
        tm = max(128, (tm // 2 // 128) * 128)
    return tm


def _make_kernel(n_inter, skip):
    assert 0 <= skip < n_inter - 1, "skip feeding last_fc is not supported"

    def kernel(*refs):
        x_ref = refs[0]
        out_ref = refs[-1]
        p = refs[1:-1]

        x = x_ref[...]                                   # (8, tm) f32
        x_bf = x.astype(jnp.bfloat16)                    # cast once

        def dense(w_ref, h):
            # (out, in) bf16 @ (in, tm) bf16 -> (out, tm) f32 MXU accumulate.
            return jnp.dot(w_ref[...], h, preferred_element_type=jnp.float32)

        # first_fc + ReLU (f32), activation stored bf16.
        # TODO(synk): nn.Dropout(0.2) after each ReLU is eval-mode identity.
        h = jnp.maximum(dense(p[0], x_bf) + p[1][...], 0.0).astype(jnp.bfloat16)

        idx = 2
        for i in range(n_inter):
            if i == skip + 1:
                # Former `cat([h, coords])` input, expressed as a split matmul
                # so every operand stays (8,128)-tile aligned.
                w_h, w_x, b = p[idx], p[idx + 1], p[idx + 2]
                idx += 3
                o = dense(w_h, h) + dense(w_x, x_bf) + b[...]
            else:
                w, b = p[idx], p[idx + 1]
                idx += 2
                o = dense(w, h) + b[...]
            h = jnp.maximum(o, 0.0).astype(jnp.bfloat16)

        # last_fc: weight padded to 8 output rows (row 0 live); tanh only on
        # the live row, then a lane-dense (1, tm) store.
        res = dense(p[idx], h) + p[idx + 1][...]          # (8, tm) f32
        out_ref[...] = jnp.tanh(res[0:1, :])

    return kernel


def init_layers(key, hidden=HIDDEN):
    """PyTorch-layout effective layers [(W (out,in) f32, b (out,) f32), ...]
    with weight_norm (dim=0) already folded in (w = g * v / ||v||_row)."""
    shapes = [(hidden, 3)]                               # first_fc
    for i in range(NUM_INTER):                           # inter_fc
        out_dim = hidden - 3 if i == SKIP else hidden
        shapes.append((out_dim, hidden))
    shapes.append((1, hidden))                           # last_fc

    layers = []
    keys = jax.random.split(key, len(shapes) * 3)
    for li, (out_dim, in_dim) in enumerate(shapes):
        kv, kg, kb = keys[3 * li], keys[3 * li + 1], keys[3 * li + 2]
        bound = 1.0 / jnp.sqrt(in_dim)
        v = jax.random.uniform(kv, (out_dim, in_dim), jnp.float32, -bound, bound)
        g = jax.random.uniform(kg, (out_dim,), jnp.float32, 0.5, 1.5)
        b = jax.random.uniform(kb, (out_dim,), jnp.float32, -bound, bound)
        w_eff = g[:, None] * v / jnp.linalg.norm(v, axis=1, keepdims=True)
        layers.append((w_eff, b))
    return layers


def prepare_kernel_params(layers, hidden=HIDDEN):
    """Feature-major kernel params: PyTorch (out, in) weights zero-padded for
    (8,128) alignment, the post-skip layer split into (W_h, W_x), weights cast
    to bf16, biases kept f32 as (out, 1) columns."""
    H = hidden
    out = []

    # first_fc: (H, 3) -> (H, 8); padded input rows of x are zero.
    w0, b0 = layers[0]
    w0p = jnp.zeros((H, 8), jnp.float32).at[:, :3].set(w0)
    out += [w0p.astype(jnp.bfloat16), b0[:, None].astype(jnp.float32)]

    for i in range(NUM_INTER):
        w, b = layers[1 + i]
        if i == SKIP:
            # (H-3, H) -> (H, H): 3 zero output rows, zero bias tail.
            wp = jnp.zeros((H, H), jnp.float32).at[:H - 3, :].set(w)
            bp = jnp.zeros((H, 1), jnp.float32).at[:H - 3, 0].set(b)
            out += [wp.astype(jnp.bfloat16), bp]
        elif i == SKIP + 1:
            # Input was cat([h (H-3), coords (3)]): split the (H, H) weight
            # along its input columns; zero columns match the zero-padded
            # skip rows / coord rows.
            w_h = jnp.zeros((H, H), jnp.float32).at[:, :H - 3].set(w[:, :H - 3])
            w_x = jnp.zeros((H, 8), jnp.float32).at[:, :3].set(w[:, H - 3:])
            out += [w_h.astype(jnp.bfloat16), w_x.astype(jnp.bfloat16),
                    b[:, None].astype(jnp.float32)]
        else:
            out += [w.astype(jnp.bfloat16), b[:, None].astype(jnp.float32)]

    # last_fc: (1, H) -> (8, H); only output row 0 is live.
    wl, bl = layers[-1]
    wlp = jnp.zeros((8, H), jnp.float32).at[:1, :].set(wl)
    blp = jnp.zeros((8, 1), jnp.float32).at[:1, 0].set(bl)
    out += [wlp.astype(jnp.bfloat16), blp]
    return out


def _build_call(kernel, n_pad, tm, param_arrays, vmem_limit_bytes):
    # coords block is (8, tm); weights/biases are full-array resident blocks
    # with a constant index_map (never re-DMA'd across grid steps).
    in_specs = [pl.BlockSpec((8, tm), lambda i: (0, i))]
    in_specs += [pl.BlockSpec(a.shape, lambda i: (0, 0)) for a in param_arrays]

    flops = int(2 * n_pad * sum(int(a.shape[0]) * int(a.shape[1])
                                for a in param_arrays
                                if a.dtype == jnp.bfloat16))
    bytes_accessed = int(n_pad * 8 * 4                       # coords (8, n_pad)
                         + n_pad * 4                         # compact output
                         + sum(a.size * a.dtype.itemsize for a in param_arrays))
    cost = pl.CostEstimate(flops=flops, transcendentals=int(n_pad),
                           bytes_accessed=bytes_accessed)

    return pl.pallas_call(
        kernel,
        out_shape=jax.ShapeDtypeStruct((1, n_pad), jnp.float32),
        grid_spec=pltpu.PrefetchScalarGridSpec(
            num_scalar_prefetch=0,
            grid=(n_pad // tm,),
            in_specs=in_specs,
            out_specs=pl.BlockSpec((1, tm), lambda i: (0, i)),
        ),
        compiler_params=pltpu.CompilerParams(
            dimension_semantics=("parallel",),
            vmem_limit_bytes=vmem_limit_bytes),
        cost_estimate=cost,
    )


def make_deepsdf(layers, hidden=HIDDEN, tm=1024, vmem_limit_bytes=None):
    """Build the forward pass once (weight_norm fold, padding, bf16 casts,
    pallas_call) and return a jitted coords (N, 3) -> (N, 1) function."""
    params = prepare_kernel_params(layers, hidden)
    kernel = _make_kernel(NUM_INTER, SKIP)

    @jax.jit
    def forward(coords):
        N = coords.shape[0]
        t = _choose_tile(N, tm)
        n_pad = _round_up(N, t)
        # Feature-major coords: (8, n_pad) f32, live rows 0..2, live cols 0..N-1.
        coords_t = jnp.zeros((8, n_pad), jnp.float32).at[:3, :N].set(
            coords.astype(jnp.float32).T)
        call = _build_call(kernel, n_pad, t, params, vmem_limit_bytes)
        out = call(coords_t, *params)                    # (1, n_pad)
        return out[0, :N][:, None]                       # (N, 1)

    return forward


def deepsdf_ref(coords, layers):
    """Pure-JAX eval-mode reference mirroring the kernel numerics (bf16 matmul
    operands, f32 accumulation), using the original row-major concat form, so
    it also validates the transposed / padded / split-weight restructuring."""
    def dense(x, w, b):
        return (jnp.dot(x.astype(jnp.bfloat16), w.T.astype(jnp.bfloat16),
                        preferred_element_type=jnp.float32) + b)

    w0, b0 = layers[0]
    h = jnp.maximum(dense(coords, w0, b0), 0.0)
    for i in range(NUM_INTER):
        w, b = layers[1 + i]
        h = jnp.maximum(dense(h, w, b), 0.0)
        if i == SKIP:
            h = jnp.concatenate([h, coords], axis=-1)
    wl, bl = layers[-1]
    return jnp.tanh(dense(h, wl, bl))


if __name__ == "__main__":
    key = jax.random.PRNGKey(0)
    k_coords, k_layers = jax.random.split(key)

    # N deliberately NOT a multiple of the tile to exercise the padding path.
    # tm=256 -> n_pad=1024, grid=4 (>= 2 steps per TensorCore on v7x).
    N = 1000
    coords = jax.random.uniform(k_coords, (N, 3), jnp.float32, -1.0, 1.0)
    layers = init_layers(k_layers, HIDDEN)

    fwd = make_deepsdf(layers, HIDDEN, tm=256)
    out = jax.block_until_ready(fwd(coords))
    ref = jax.block_until_ready(deepsdf_ref(coords, layers))

    assert out.shape == (N, 1), out.shape
    err = float(jnp.max(jnp.abs(out - ref)))
    # Kernel and reference both use bf16 MXU operands with f32 accumulation,
    # so they agree tightly; vs. a pure-f32 PyTorch forward expect ~1e-2.
    assert err < 1e-3, err
    print("KERNEL_OK")
</pallas_src>

<mosaic_0001>
module attributes {stable_mosaic.version = 11 : i64} {
  func.func @kernel(%arg0: i32, %arg1: memref<8x256xf32, #tpu.memory_space<vmem>>, %arg2: memref<128x8xbf16, #tpu.memory_space<vmem>>, %arg3: memref<128x1xf32, #tpu.memory_space<vmem>>, %arg4: memref<128x128xbf16, #tpu.memory_space<vmem>>, %arg5: memref<128x1xf32, #tpu.memory_space<vmem>>, %arg6: memref<128x128xbf16, #tpu.memory_space<vmem>>, %arg7: memref<128x1xf32, #tpu.memory_space<vmem>>, %arg8: memref<128x128xbf16, #tpu.memory_space<vmem>>, %arg9: memref<128x1xf32, #tpu.memory_space<vmem>>, %arg10: memref<128x128xbf16, #tpu.memory_space<vmem>>, %arg11: memref<128x1xf32, #tpu.memory_space<vmem>>, %arg12: memref<128x128xbf16, #tpu.memory_space<vmem>>, %arg13: memref<128x8xbf16, #tpu.memory_space<vmem>>, %arg14: memref<128x1xf32, #tpu.memory_space<vmem>>, %arg15: memref<128x128xbf16, #tpu.memory_space<vmem>>, %arg16: memref<128x1xf32, #tpu.memory_space<vmem>>, %arg17: memref<8x128xbf16, #tpu.memory_space<vmem>>, %arg18: memref<8x1xf32, #tpu.memory_space<vmem>>, %arg19: memref<1x256xf32, #tpu.memory_space<vmem>>) attributes {dimension_semantics = [#tpu.dimension_semantics<parallel>], iteration_bounds = array<i64: 4>, scalar_prefetch = 0 : i64, scratch_operands = 0 : i64, tpu.core_type = #tpu.core_type<tc>, window_params = [{transform_indices = @transform_0, window_bounds = array<i64: 8, 256>}, {pipeline_mode = #tpu.pipeline_mode<synchronous>, transform_indices = @transform_1, window_bounds = array<i64: 128, 8>}, {pipeline_mode = #tpu.pipeline_mode<synchronous>, transform_indices = @transform_2, window_bounds = array<i64: 128, 1>}, {pipeline_mode = #tpu.pipeline_mode<synchronous>, transform_indices = @transform_3, window_bounds = array<i64: 128, 128>}, {pipeline_mode = #tpu.pipeline_mode<synchronous>, transform_indices = @transform_4, window_bounds = array<i64: 128, 1>}, {pipeline_mode = #tpu.pipeline_mode<synchronous>, transform_indices = @transform_5, window_bounds = array<i64: 128, 128>}, {pipeline_mode = #tpu.pipeline_mode<synchronous>, transform_indices = @transform_6, window_bounds = array<i64: 128, 1>}, {pipeline_mode = #tpu.pipeline_mode<synchronous>, transform_indices = @transform_7, window_bounds = array<i64: 128, 128>}, {pipeline_mode = #tpu.pipeline_mode<synchronous>, transform_indices = @transform_8, window_bounds = array<i64: 128, 1>}, {pipeline_mode = #tpu.pipeline_mode<synchronous>, transform_indices = @transform_9, window_bounds = array<i64: 128, 128>}, {pipeline_mode = #tpu.pipeline_mode<synchronous>, transform_indices = @transform_10, window_bounds = array<i64: 128, 1>}, {pipeline_mode = #tpu.pipeline_mode<synchronous>, transform_indices = @transform_11, window_bounds = array<i64: 128, 128>}, {pipeline_mode = #tpu.pipeline_mode<synchronous>, transform_indices = @transform_12, window_bounds = array<i64: 128, 8>}, {pipeline_mode = #tpu.pipeline_mode<synchronous>, transform_indices = @transform_13, window_bounds = array<i64: 128, 1>}, {pipeline_mode = #tpu.pipeline_mode<synchronous>, transform_indices = @transform_14, window_bounds = array<i64: 128, 128>}, {pipeline_mode = #tpu.pipeline_mode<synchronous>, transform_indices = @transform_15, window_bounds = array<i64: 128, 1>}, {pipeline_mode = #tpu.pipeline_mode<synchronous>, transform_indices = @transform_16, window_bounds = array<i64: 8, 128>}, {pipeline_mode = #tpu.pipeline_mode<synchronous>, transform_indices = @transform_17, window_bounds = array<i64: 8, 1>}, {transform_indices = @transform_18, window_bounds = array<i64: 1, 256>}]} {
    %c0 = arith.constant 0 : index
    %c0_0 = arith.constant 0 : index
    %0 = vector.load %arg1[%c0, %c0_0] : memref<8x256xf32, #tpu.memory_space<vmem>>, vector<8x256xf32>
    %1 = arith.truncf %0 : vector<8x256xf32> to vector<8x256xbf16>
    %c0_1 = arith.constant 0 : index
    %c0_2 = arith.constant 0 : index
    %2 = vector.load %arg2[%c0_1, %c0_2] : memref<128x8xbf16, #tpu.memory_space<vmem>>, vector<128x8xbf16>
    %cst = arith.constant dense<0.000000e+00> : vector<128x256xf32>
    %3 = tpu.matmul %2, %1, %cst {dimension_numbers = #tpu.dot_dimension_numbers<[1], [0], [0], [1], [0, 0, 1, 1], [], []>} : vector<128x8xbf16>, vector<8x256xbf16>, vector<128x256xf32> -> vector<128x256xf32>
    %c0_3 = arith.constant 0 : index
    %c0_4 = arith.constant 0 : index
    %4 = vector.load %arg3[%c0_3, %c0_4] : memref<128x1xf32, #tpu.memory_space<vmem>>, vector<128x1xf32>
    %5 = vector.broadcast %4 : vector<128x1xf32> to vector<128x256xf32>
    %6 = arith.addf %3, %5 : vector<128x256xf32>
    %cst_5 = arith.constant 0.000000e+00 : f32
    %7 = vector.broadcast %cst_5 : f32 to vector<128x256xf32>
    %8 = arith.maximumf %6, %7 : vector<128x256xf32>
    %9 = arith.truncf %8 : vector<128x256xf32> to vector<128x256xbf16>
    %c0_6 = arith.constant 0 : index
    %c0_7 = arith.constant 0 : index
    %10 = vector.load %arg4[%c0_6, %c0_7] : memref<128x128xbf16, #tpu.memory_space<vmem>>, vector<128x128xbf16>
    %cst_8 = arith.constant dense<0.000000e+00> : vector<128x256xf32>
    %11 = tpu.matmul %10, %9, %cst_8 {dimension_numbers = #tpu.dot_dimension_numbers<[1], [0], [0], [1], [0, 0, 1, 1], [], []>} : vector<128x128xbf16>, vector<128x256xbf16>, vector<128x256xf32> -> vector<128x256xf32>
    %c0_9 = arith.constant 0 : index
    %c0_10 = arith.constant 0 : index
    %12 = vector.load %arg5[%c0_9, %c0_10] : memref<128x1xf32, #tpu.memory_space<vmem>>, vector<128x1xf32>
    %13 = vector.broadcast %12 : vector<128x1xf32> to vector<128x256xf32>
    %14 = arith.addf %11, %13 : vector<128x256xf32>
    %cst_11 = arith.constant 0.000000e+00 : f32
    %15 = vector.broadcast %cst_11 : f32 to vector<128x256xf32>
    %16 = arith.maximumf %14, %15 : vector<128x256xf32>
    %17 = arith.truncf %16 : vector<128x256xf32> to vector<128x256xbf16>
    %c0_12 = arith.constant 0 : index
    %c0_13 = arith.constant 0 : index
    %18 = vector.load %arg6[%c0_12, %c0_13] : memref<128x128xbf16, #tpu.memory_space<vmem>>, vector<128x128xbf16>
    %cst_14 = arith.constant dense<0.000000e+00> : vector<128x256xf32>
    %19 = tpu.matmul %18, %17, %cst_14 {dimension_numbers = #tpu.dot_dimension_numbers<[1], [0], [0], [1], [0, 0, 1, 1], [], []>} : vector<128x128xbf16>, vector<128x256xbf16>, vector<128x256xf32> -> vector<128x256xf32>
    %c0_15 = arith.constant 0 : index
    %c0_16 = arith.constant 0 : index
    %20 = vector.load %arg7[%c0_15, %c0_16] : memref<128x1xf32, #tpu.memory_space<vmem>>, vector<128x1xf32>
    %21 = vector.broadcast %20 : vector<128x1xf32> to vector<128x256xf32>
    %22 = arith.addf %19, %21 : vector<128x256xf32>
    %cst_17 = arith.constant 0.000000e+00 : f32
    %23 = vector.broadcast %cst_17 : f32 to vector<128x256xf32>
    %24 = arith.maximumf %22, %23 : vector<128x256xf32>
    %25 = arith.truncf %24 : vector<128x256xf32> to vector<128x256xbf16>
    %c0_18 = arith.constant 0 : index
    %c0_19 = arith.constant 0 : index
    %26 = vector.load %arg8[%c0_18, %c0_19] : memref<128x128xbf16, #tpu.memory_space<vmem>>, vector<128x128xbf16>
    %cst_20 = arith.constant dense<0.000000e+00> : vector<128x256xf32>
    %27 = tpu.matmul %26, %25, %cst_20 {dimension_numbers = #tpu.dot_dimension_numbers<[1], [0], [0], [1], [0, 0, 1, 1], [], []>} : vector<128x128xbf16>, vector<128x256xbf16>, vector<128x256xf32> -> vector<128x256xf32>
    %c0_21 = arith.constant 0 : index
    %c0_22 = arith.constant 0 : index
    %28 = vector.load %arg9[%c0_21, %c0_22] : memref<128x1xf32, #tpu.memory_space<vmem>>, vector<128x1xf32>
    %29 = vector.broadcast %28 : vector<128x1xf32> to vector<128x256xf32>
    %30 = arith.addf %27, %29 : vector<128x256xf32>
    %cst_23 = arith.constant 0.000000e+00 : f32
    %31 = vector.broadcast %cst_23 : f32 to vector<128x256xf32>
    %32 = arith.maximumf %30, %31 : vector<128x256xf32>
    %33 = arith.truncf %32 : vector<128x256xf32> to vector<128x256xbf16>
    %c0_24 = arith.constant 0 : index
    %c0_25 = arith.constant 0 : index
    %34 = vector.load %arg10[%c0_24, %c0_25] : memref<128x128xbf16, #tpu.memory_space<vmem>>, vector<128x128xbf16>
    %cst_26 = arith.constant dense<0.000000e+00> : vector<128x256xf32>
    %35 = tpu.matmul %34, %33, %cst_26 {dimension_numbers = #tpu.dot_dimension_numbers<[1], [0], [0], [1], [0, 0, 1, 1], [], []>} : vector<128x128xbf16>, vector<128x256xbf16>, vector<128x256xf32> -> vector<128x256xf32>
    %c0_27 = arith.constant 0 : index
    %c0_28 = arith.constant 0 : index
    %36 = vector.load %arg11[%c0_27, %c0_28] : memref<128x1xf32, #tpu.memory_space<vmem>>, vector<128x1xf32>
    %37 = vector.broadcast %36 : vector<128x1xf32> to vector<128x256xf32>
    %38 = arith.addf %35, %37 : vector<128x256xf32>
    %cst_29 = arith.constant 0.000000e+00 : f32
    %39 = vector.broadcast %cst_29 : f32 to vector<128x256xf32>
    %40 = arith.maximumf %38, %39 : vector<128x256xf32>
    %41 = arith.truncf %40 : vector<128x256xf32> to vector<128x256xbf16>
    %c0_30 = arith.constant 0 : index
    %c0_31 = arith.constant 0 : index
    %42 = vector.load %arg12[%c0_30, %c0_31] : memref<128x128xbf16, #tpu.memory_space<vmem>>, vector<128x128xbf16>
    %cst_32 = arith.constant dense<0.000000e+00> : vector<128x256xf32>
    %43 = tpu.matmul %42, %41, %cst_32 {dimension_numbers = #tpu.dot_dimension_numbers<[1], [0], [0], [1], [0, 0, 1, 1], [], []>} : vector<128x128xbf16>, vector<128x256xbf16>, vector<128x256xf32> -> vector<128x256xf32>
    %c0_33 = arith.constant 0 : index
    %c0_34 = arith.constant 0 : index
    %44 = vector.load %arg13[%c0_33, %c0_34] : memref<128x8xbf16, #tpu.memory_space<vmem>>, vector<128x8xbf16>
    %cst_35 = arith.constant dense<0.000000e+00> : vector<128x256xf32>
    %45 = tpu.matmul %44, %1, %cst_35 {dimension_numbers = #tpu.dot_dimension_numbers<[1], [0], [0], [1], [0, 0, 1, 1], [], []>} : vector<128x8xbf16>, vector<8x256xbf16>, vector<128x256xf32> -> vector<128x256xf32>
    %46 = arith.addf %43, %45 : vector<128x256xf32>
    %c0_36 = arith.constant 0 : index
    %c0_37 = arith.constant 0 : index
    %47 = vector.load %arg14[%c0_36, %c0_37] : memref<128x1xf32, #tpu.memory_space<vmem>>, vector<128x1xf32>
    %48 = vector.broadcast %47 : vector<128x1xf32> to vector<128x256xf32>
    %49 = arith.addf %46, %48 : vector<128x256xf32>
    %cst_38 = arith.constant 0.000000e+00 : f32
    %50 = vector.broadcast %cst_38 : f32 to vector<128x256xf32>
    %51 = arith.maximumf %49, %50 : vector<128x256xf32>
    %52 = arith.truncf %51 : vector<128x256xf32> to vector<128x256xbf16>
    %c0_39 = arith.constant 0 : index
    %c0_40 = arith.constant 0 : index
    %53 = vector.load %arg15[%c0_39, %c0_40] : memref<128x128xbf16, #tpu.memory_space<vmem>>, vector<128x128xbf16>
    %cst_41 = arith.constant dense<0.000000e+00> : vector<128x256xf32>
    %54 = tpu.matmul %53, %52, %cst_41 {dimension_numbers = #tpu.dot_dimension_numbers<[1], [0], [0], [1], [0, 0, 1, 1], [], []>} : vector<128x128xbf16>, vector<128x256xbf16>, vector<128x256xf32> -> vector<128x256xf32>
    %c0_42 = arith.constant 0 : index
    %c0_43 = arith.constant 0 : index
    %55 = vector.load %arg16[%c0_42, %c0_43] : memref<128x1xf32, #tpu.memory_space<vmem>>, vector<128x1xf32>
    %56 = vector.broadcast %55 : vector<128x1xf32> to vector<128x256xf32>
    %57 = arith.addf %54, %56 : vector<128x256xf32>
    %cst_44 = arith.constant 0.000000e+00 : f32
    %58 = vector.broadcast %cst_44 : f32 to vector<128x256xf32>
    %59 = arith.maximumf %57, %58 : vector<128x256xf32>
    %60 = arith.truncf %59 : vector<128x256xf32> to vector<128x256xbf16>
    %c0_45 = arith.constant 0 : index
    %c0_46 = arith.constant 0 : index
    %61 = vector.load %arg17[%c0_45, %c0_46] : memref<8x128xbf16, #tpu.memory_space<vmem>>, vector<8x128xbf16>
    %cst_47 = arith.constant dense<0.000000e+00> : vector<8x256xf32>
    %62 = tpu.matmul %61, %60, %cst_47 {dimension_numbers = #tpu.dot_dimension_numbers<[1], [0], [0], [1], [0, 0, 1, 1], [], []>} : vector<8x128xbf16>, vector<128x256xbf16>, vector<8x256xf32> -> vector<8x256xf32>
    %c0_48 = arith.constant 0 : index
    %c0_49 = arith.constant 0 : index
    %63 = vector.load %arg18[%c0_48, %c0_49] : memref<8x1xf32, #tpu.memory_space<vmem>>, vector<8x1xf32>
    %64 = vector.broadcast %63 : vector<8x1xf32> to vector<8x256xf32>
    %65 = arith.addf %62, %64 : vector<8x256xf32>
    %66 = vector.extract_strided_slice %65 {offsets = [0, 0], sizes = [1, 256], strides = [1, 1]} : vector<8x256xf32> to vector<1x256xf32>
    %67 = math.tanh %66 : vector<1x256xf32>
    %c0_50 = arith.constant 0 : index
    %c0_51 = arith.constant 0 : index
    %68 = vector.load %arg19[%c0_50, %c0_51] : memref<1x256xf32, #tpu.memory_space<vmem>>, vector<1x256xf32>
    tpu.vector_store %arg19[%c0_50, %c0_51], %67 {strides = array<i32>} : memref<1x256xf32, #tpu.memory_space<vmem>>, vector<1x256xf32>,
    return
  }
  func.func @transform_0(%arg0: i32) -> (i32, i32) {
    %c0_i32 = arith.constant 0 : i32
    %c0_i32_0 = arith.constant 0 : i32
    return %c0_i32, %arg0 : i32, i32
  }
  func.func @transform_1(%arg0: i32) -> (i32, i32) {
    %c0_i32 = arith.constant 0 : i32
    %c0_i32_0 = arith.constant 0 : i32
    %c0_i32_1 = arith.constant 0 : i32
    return %c0_i32, %c0_i32_0 : i32, i32
  }
  func.func @transform_2(%arg0: i32) -> (i32, i32) {
    %c0_i32 = arith.constant 0 : i32
    %c0_i32_0 = arith.constant 0 : i32
    %c0_i32_1 = arith.constant 0 : i32
    return %c0_i32, %c0_i32_0 : i32, i32
  }
  func.func @transform_3(%arg0: i32) -> (i32, i32) {
    %c0_i32 = arith.constant 0 : i32
    %c0_i32_0 = arith.constant 0 : i32
    %c0_i32_1 = arith.constant 0 : i32
    return %c0_i32, %c0_i32_0 : i32, i32
  }
  func.func @transform_4(%arg0: i32) -> (i32, i32) {
    %c0_i32 = arith.constant 0 : i32
    %c0_i32_0 = arith.constant 0 : i32
    %c0_i32_1 = arith.constant 0 : i32
    return %c0_i32, %c0_i32_0 : i32, i32
  }
  func.func @transform_5(%arg0: i32) -> (i32, i32) {
    %c0_i32 = arith.constant 0 : i32
    %c0_i32_0 = arith.constant 0 : i32
    %c0_i32_1 = arith.constant 0 : i32
    return %c0_i32, %c0_i32_0 : i32, i32
  }
  func.func @transform_6(%arg0: i32) -> (i32, i32) {
    %c0_i32 = arith.constant 0 : i32
    %c0_i32_0 = arith.constant 0 : i32
    %c0_i32_1 = arith.constant 0 : i32
    return %c0_i32, %c0_i32_0 : i32, i32
  }
  func.func @transform_7(%arg0: i32) -> (i32, i32) {
    %c0_i32 = arith.constant 0 : i32
    %c0_i32_0 = arith.constant 0 : i32
    %c0_i32_1 = arith.constant 0 : i32
    return %c0_i32, %c0_i32_0 : i32, i32
  }
  func.func @transform_8(%arg0: i32) -> (i32, i32) {
    %c0_i32 = arith.constant 0 : i32
    %c0_i32_0 = arith.constant 0 : i32
    %c0_i32_1 = arith.constant 0 : i32
    return %c0_i32, %c0_i32_0 : i32, i32
  }
  func.func @transform_9(%arg0: i32) -> (i32, i32) {
    %c0_i32 = arith.constant 0 : i32
    %c0_i32_0 = arith.constant 0 : i32
    %c0_i32_1 = arith.constant 0 : i32
    return %c0_i32, %c0_i32_0 : i32, i32
  }
  func.func @transform_10(%arg0: i32) -> (i32, i32) {
    %c0_i32 = arith.constant 0 : i32
    %c0_i32_0 = arith.constant 0 : i32
    %c0_i32_1 = arith.constant 0 : i32
    return %c0_i32, %c0_i32_0 : i32, i32
  }
  func.func @transform_11(%arg0: i32) -> (i32, i32) {
    %c0_i32 = arith.constant 0 : i32
    %c0_i32_0 = arith.constant 0 : i32
    %c0_i32_1 = arith.constant 0 : i32
    return %c0_i32, %c0_i32_0 : i32, i32
  }
  func.func @transform_12(%arg0: i32) -> (i32, i32) {
    %c0_i32 = arith.constant 0 : i32
    %c0_i32_0 = arith.constant 0 : i32
    %c0_i32_1 = arith.constant 0 : i32
    return %c0_i32, %c0_i32_0 : i32, i32
  }
  func.func @transform_13(%arg0: i32) -> (i32, i32) {
    %c0_i32 = arith.constant 0 : i32
    %c0_i32_0 = arith.constant 0 : i32
    %c0_i32_1 = arith.constant 0 : i32
    return %c0_i32, %c0_i32_0 : i32, i32
  }
  func.func @transform_14(%arg0: i32) -> (i32, i32) {
    %c0_i32 = arith.constant 0 : i32
    %c0_i32_0 = arith.constant 0 : i32
    %c0_i32_1 = arith.constant 0 : i32
    return %c0_i32, %c0_i32_0 : i32, i32
  }
  func.func @transform_15(%arg0: i32) -> (i32, i32) {
    %c0_i32 = arith.constant 0 : i32
    %c0_i32_0 = arith.constant 0 : i32
    %c0_i32_1 = arith.constant 0 : i32
    return %c0_i32, %c0_i32_0 : i32, i32
  }
  func.func @transform_16(%arg0: i32) -> (i32, i32) {
    %c0_i32 = arith.constant 0 : i32
    %c0_i32_0 = arith.constant 0 : i32
    %c0_i32_1 = arith.constant 0 : i32
    return %c0_i32, %c0_i32_0 : i32, i32
  }
  func.func @transform_17(%arg0: i32) -> (i32, i32) {
    %c0_i32 = arith.constant 0 : i32
    %c0_i32_0 = arith.constant 0 : i32
    %c0_i32_1 = arith.constant 0 : i32
    return %c0_i32, %c0_i32_0 : i32, i32
  }
  func.func @transform_18(%arg0: i32) -> (i32, i32) {
    %c0_i32 = arith.constant 0 : i32
    %c0_i32_0 = arith.constant 0 : i32
    return %c0_i32, %arg0 : i32, i32
  }
}

</mosaic_0001>

<bundles_post_ra>
// kernel: forward.1
= control target key start
LH: loop header
LB: loop body
LE: loop exit
PB: predicated region body
PF: predicated region fallthrough
CT: control target
= control target key end

     0   :  { %s4990_s0 = inlined_call_operand.vmem [shape: f32[8,1024], index: 0, kind: input, shape index: {}]   ;;  %s4991_s1 = inlined_call_operand.hbm [shape: bf16[128,8], index: 1, kind: input, shape index: {}]   ;;  %s4992_s2 = inlined_call_operand.hbm [shape: f32[128,1], index: 2, kind: input, shape index: {}]   ;;  %s4993_s3 = inlined_call_operand.hbm [shape: bf16[128,128], index: 3, kind: input, shape index: {}]   ;;  %s4994_s4 = inlined_call_operand.hbm [shape: f32[128,1], index: 4, kind: input, shape index: {}]   ;;  %s4995_s5 = inlined_call_operand.hbm [shape: bf16[128,128], index: 5, kind: input, shape index: {}]   ;;  %s4996_s6 = inlined_call_operand.hbm [shape: f32[128,1], index: 6, kind: input, shape index: {}]   ;;  %s4997_s7 = inlined_call_operand.hbm [shape: bf16[128,128], index: 7, kind: input, shape index: {}]   ;;  %s4998_s8 = inlined_call_operand.hbm [shape: f32[128,1], index: 8, kind: input, shape index: {}]   ;;  %s4999_s9 = inlined_call_operand.hbm [shape: bf16[128,128], index: 9, kind: input, shape index: {}]   ;;  %s5000_s10 = inlined_call_operand.hbm [shape: f32[128,1], index: 10, kind: input, shape index: {}]   ;;  %s5001_s11 = inlined_call_operand.hbm [shape: bf16[128,128], index: 11, kind: input, shape index: {}]   ;;  %s5002_s12 = inlined_call_operand.vmem [shape: bf16[128,8], index: 12, kind: input, shape index: {}]   ;;  %s5003_s13 = inlined_call_operand.hbm [shape: f32[128,1], index: 13, kind: input, shape index: {}]   ;;  %s5004_s14 = inlined_call_operand.vmem [shape: bf16[128,128], index: 14, kind: input, shape index: {}]   ;;  %s5005_s15 = inlined_call_operand.hbm [shape: f32[128,1], index: 15, kind: input, shape index: {}]   ;;  %s5006_s16 = inlined_call_operand.vmem [shape: bf16[8,128], index: 16, kind: input, shape index: {}]   ;;  %s5007_s17 = inlined_call_operand.vmem [shape: f32[8,1], index: 17, kind: input, shape index: {}]   ;;  %s5008_s18 = inlined_call_operand.vmem [shape: f32[1,1024], index: 18, kind: output, shape index: {}]  }
   0x1   :  { %5020 = sst [smem:[#allocation30_spill]] %s4990_s0 }
   0x2   :  { %5021 = sst [smem:[#allocation31_spill]] %s4991_s1 }
   0x3   :  { %5022 = sst [smem:[#allocation32_spill]] %s4992_s2 }
   0x4   :  { %5023 = sst [smem:[#allocation33_spill]] %s5002_s12 }
   0x5   :  { %5024 = sst [smem:[#allocation34_spill]] %s5004_s14 }
   0x6   :  { %5025 = sst [smem:[#allocation35_spill]] %s5006_s16 }
   0x7   :  { %5026 = sst [smem:[#allocation36_spill]] %s5007_s17 }
   0x8   :  { %5027 = sst [smem:[#allocation37_spill]] %s5008_s18 }
   0x9   :  { %23 = vsyncpa [#allocation3], 0 }
   0xa   :  { %24 = vsyncpa [#allocation5], 0 }
   0xb   :  { %25 = vsyncpa [#allocation8], 0 }
   0xc   :  { %26 = vsyncpa [#allocation11], 0 }
   0xd   :  { %27 = vsyncpa [#allocation14], 0 }
   0xe   :  { %28 = vsyncpa [#allocation17], 0 }
   0xf   :  { %29 = vsyncpa [#allocation20], 0  ;;  %s4395_s27 = smov 0  }
  0x10 LB: > { %5028 = sst [smem:[#allocation29_spill]] %s4279_s27  ;;  %s4281_s28 = smov [#allocation4]   ;;  %s4279_s27 = sphi %s4395_s27, %s35_s27  }
  0x11   : > { %s474_s29 = sshll.u32 %s4281_s28, 4  ;;  %s5011_s30 = sadd.s32 4294967295, %s4279_s27   ;;  %s4409_s29 = int_to_ptr.vmem [resolvable:$true] %s474_s29 }
  0x12   : > { %p3518_p0 = scmp.ge.s32.totalorder %s4279_s27, 1  ;;  %p449_p1 = scmp.lt.s32.totalorder %s4279_s27, 5 }
  0x13   : > { %p4405_p2 = scmp.eq.s32.totalorder %s5011_s30, 0  ;;  %s4282_s1 = smov [#allocation7]  }
  0x14   : > { %p4411_p3 = pnand %p3518_p0, %p449_p1  ;;  %s500_s20 = sshll.u32 %s4282_s1, 4  ;;  %s4417_s20 = int_to_ptr.vmem [resolvable:$true] %s500_s20 }
  0x15   : > { %s5029_s0 = scalar_select %p4405_p2, 1, 0 }
  0x16   : > { %s5030_s19 = scalar_select %p4411_p3, 1, 0 }
  0x17   : > { %p3718_p4 = pneg %p4411_p3  ;;  %s4283_s22 = smov [#allocation10]  }
  0x18   : > { %s526_s2 = sshll.u32 %s4283_s22, 4  ;;  %s4284_s23 = smov [#allocation13]   ;;  %s4425_s2 = int_to_ptr.vmem [resolvable:$true] %s526_s2 }
  0x19   : > { %p4421_p5 = pnand %p4405_p2, %p3718_p4  ;;  %s4427_s24 = sshll.u32 %s4284_s23, 4  ;;  %s553_s24 = int_to_ptr.vmem [resolvable:$true] %s4427_s24 }
  0x1a   : > { %s5032_s28 = sld [smem:[#allocation32_spill]] }
  0x1b   : > { %p4437_p7 = pneg %p4421_p5 }
  0x20   : > { %s3881_s30 = scalar_lea.hbm %s5032_s28, 2048 }
  0x21   : > { %p3882_p6 = scmp.ne.s32.totalorder %s5032_s28, %s3881_s30  ;;  %p3888_p10 = scmp.lt.u32.totalorder %s3881_s30, %s5032_s28 }
  0x23   : > { %p3884_p8 = pnand %p4437_p7, %p3882_p6 }
  0x25   : > { %p3885_p9 = pneg %p3884_p8 }
  0x27   : > { %p3890_p11 = pnand %p3888_p10, %p3885_p9 }
  0x29   : > { %3893 = shalt.err (!%p3890_p11)
}
  0x2a   : > { %s3894_s18 = scalar_lea.vmem %s4409_s29, 2048  ;;  %p3902_p1 = scmp.lt.s32.totalorder %s4409_s29, %s4409_s29 }
  0x2b   : > { %p3895_p12 = scmp.ne.s32.totalorder %s4409_s29, %s3894_s18  ;;  %p3903_p4 = scmp.lt.s32.totalorder %s3894_s18, %s3894_s18 }
  0x2d   : > { %p3897_p13 = pnand %p3895_p12, %p4437_p7  ;;  %p3904_p6 = por %p3903_p4, %p3902_p1 }
  0x2f   : > { %p3898_p0 = pneg %p3897_p13 }
  0x31   : > { %p3905_p8 = pnand %p3904_p6, %p3898_p0 }
  0x33   : > { %3908 = shalt.err (!%p3905_p8)
}
  0x34   : > { %s5018_s25 = smov 128   ;;  %s5019_s30 = smov 8  }
  0x35   : > { %3724 = dma.hbm_to_vmem [thread:$0]  (!%p4421_p5), %s5032_s28, 2048, %s4409_s29, [#allocation5], %s5018_s25, %s5018_s25, %s5019_s30  }
  0x36   : > { %s3909_s18 = scalar_lea.hbm %s4994_s4, 2048 }
  0x37   : > { %p3910_p9 = scmp.ne.s32.totalorder %s4994_s4, %s3909_s18  ;;  %p3916_p12 = scmp.lt.u32.totalorder %s3909_s18, %s4994_s4 }
  0x39   : > { %p3912_p10 = pnand %p3910_p9, %p4437_p7 }
  0x3b   : > { %p3913_p11 = pneg %p3912_p10 }
  0x3d   : > { %p3918_p13 = pnand %p3916_p12, %p3913_p11 }
  0x3f   : > { %3921 = shalt.err (!%p3918_p13)
}
  0x40   : > { %s3922_s29 = scalar_lea.vmem %s4417_s20, 2048  ;;  %p3930_p6 = scmp.lt.s32.totalorder %s4417_s20, %s4417_s20 }
  0x41   : > { %p3923_p0 = scmp.ne.s32.totalorder %s4417_s20, %s3922_s29  ;;  %p3931_p8 = scmp.lt.s32.totalorder %s3922_s29, %s3922_s29 }
  0x43   : > { %p3925_p1 = pnand %p3923_p0, %p4437_p7  ;;  %p3932_p9 = por %p3931_p8, %p3930_p6 }
  0x45   : > { %p3926_p4 = pneg %p3925_p1 }
  0x47   : > { %p3933_p10 = pnand %p3932_p9, %p3926_p4 }
  0x49   : > { %3936 = shalt.err (!%p3933_p10)
}
  0x4a   : > { %3730 = dma.hbm_to_vmem [thread:$0]  (!%p4421_p5), %s4994_s4, 2048, %s4417_s20, [#allocation8], %s5018_s25, %s5018_s25, %s5019_s30  }
  0x4b   : > { %s3937_s26 = scalar_lea.hbm %s4996_s6, 2048 }
  0x4c   : > { %p3938_p11 = scmp.ne.s32.totalorder %s4996_s6, %s3937_s26  ;;  %p3944_p0 = scmp.lt.u32.totalorder %s3937_s26, %s4996_s6 }
  0x4e   : > { %p3940_p12 = pnand %p3938_p11, %p4437_p7 }
  0x50   : > { %p3941_p13 = pneg %p3940_p12 }
  0x52   : > { %p3946_p1 = pnand %p3944_p0, %p3941_p13 }
  0x54   : > { %3949 = shalt.err (!%p3946_p1)
}
  0x55   : > { %s3950_s20 = scalar_lea.vmem %s4425_s2, 2048  ;;  %p3958_p9 = scmp.lt.s32.totalorder %s4425_s2, %s4425_s2 }
  0x56   : > { %p3951_p4 = scmp.ne.s32.totalorder %s4425_s2, %s3950_s20  ;;  %p3959_p10 = scmp.lt.s32.totalorder %s3950_s20, %s3950_s20 }
  0x58   : > { %p3953_p6 = pnand %p3951_p4, %p4437_p7  ;;  %p3960_p11 = por %p3959_p10, %p3958_p9 }
  0x5a   : > { %p3954_p8 = pneg %p3953_p6 }
  0x5c   : > { %p3961_p12 = pnand %p3960_p11, %p3954_p8 }
  0x5e   : > { %3964 = shalt.err (!%p3961_p12)
}
  0x5f   : > { %3736 = dma.hbm_to_vmem [thread:$0]  (!%p4421_p5), %s4996_s6, 2048, %s4425_s2, [#allocation11], %s5018_s25, %s5018_s25, %s5019_s30  }
  0x60   : > { %s3965_s27 = scalar_lea.hbm %s4998_s8, 2048 }
  0x61   : > { %p3966_p13 = scmp.ne.s32.totalorder %s4998_s8, %s3965_s27  ;;  %p3972_p4 = scmp.lt.u32.totalorder %s3965_s27, %s4998_s8 }
  0x63   : > { %p3968_p0 = pnand %p3966_p13, %p4437_p7 }
  0x65   : > { %p3969_p1 = pneg %p3968_p0 }
  0x67   : > { %p3974_p6 = pnand %p3972_p4, %p3969_p1 }
  0x69   : > { %3977 = shalt.err (!%p3974_p6)
}
  0x6a   : > { %s3978_s18 = scalar_lea.vmem %s553_s24, 2048  ;;  %p3986_p11 = scmp.lt.s32.totalorder %s553_s24, %s553_s24 }
  0x6b   : > { %p3979_p8 = scmp.ne.s32.totalorder %s553_s24, %s3978_s18  ;;  %p3987_p12 = scmp.lt.s32.totalorder %s3978_s18, %s3978_s18 }
  0x6d   : > { %p3981_p9 = pnand %p3979_p8, %p4437_p7  ;;  %p3988_p2 = por %p3987_p12, %p3986_p11 }
  0x6f   : > { %p3982_p10 = pneg %p3981_p9 }
  0x71   : > { %p3989_p3 = pnand %p3988_p2, %p3982_p10 }
  0x73   : > { %3992 = shalt.err (!%p3989_p3)
}
  0x74   : > { %3742 = dma.hbm_to_vmem [thread:$0]  (!%p4421_p5), %s4998_s8, 2048, %s553_s24, [#allocation14], %s5018_s25, %s5018_s25, %s5019_s30  }
  0x75   : > { %s4287_s29 = smov [#allocation16]   ;;  %s4288_s14 = smov [#allocation19]  }
  0x76   : > { %s578_s12 = sshll.u32 %s4287_s29, 4  ;;  %s607_s17 = sshll.u32 %s4288_s14, 4  ;;  %s579_s12 = int_to_ptr.vmem [resolvable:$true] %s578_s12  ;;  %s608_s17 = int_to_ptr.vmem [resolvable:$true] %s607_s17 }
  0x77   : > { %s3993_s1 = scalar_lea.hbm %s5000_s10, 2048 }
  0x78   : > { %p3994_p2 = scmp.ne.s32.totalorder %s5000_s10, %s3993_s1  ;;  %p4000_p0 = scmp.lt.u32.totalorder %s3993_s1, %s5000_s10 }
  0x7a   : > { %p3996_p3 = pnand %p3994_p2, %p4437_p7 }
  0x7c   : > { %p3997_p13 = pneg %p3996_p3 }
  0x7e   : > { %p4002_p1 = pnand %p4000_p0, %p3997_p13 }
  0x80   : > { %4005 = shalt.err (!%p4002_p1)
}
  0x81   : > { %s4006_s24 = scalar_lea.vmem %s579_s12, 2048  ;;  %p4014_p9 = scmp.lt.s32.totalorder %s579_s12, %s579_s12 }
  0x82   : > { %p4007_p4 = scmp.ne.s32.totalorder %s579_s12, %s4006_s24  ;;  %p4015_p10 = scmp.lt.s32.totalorder %s4006_s24, %s4006_s24 }
  0x84   : > { %p4009_p6 = pnand %p4007_p4, %p4437_p7  ;;  %p4016_p11 = por %p4015_p10, %p4014_p9 }
  0x86   : > { %p4010_p8 = pneg %p4009_p6 }
  0x88   : > { %p4017_p12 = pnand %p4016_p11, %p4010_p8 }
  0x8a   : > { %4020 = shalt.err (!%p4017_p12)
}
  0x8b   : > { %3748 = dma.hbm_to_vmem [thread:$0]  (!%p4421_p5), %s5000_s10, 2048, %s579_s12, [#allocation17], %s5018_s25, %s5018_s25, %s5019_s30  }
  0x8c   : > { %s4021_s26 = scalar_lea.hbm %s5003_s13, 2048 }
  0x8d   : > { %p4022_p2 = scmp.ne.s32.totalorder %s5003_s13, %s4021_s26  ;;  %p4028_p0 = scmp.lt.u32.totalorder %s4021_s26, %s5003_s13 }
  0x8f   : > { %p4024_p3 = pnand %p4022_p2, %p4437_p7 }
  0x91   : > { %p4025_p13 = pneg %p4024_p3 }
  0x93   : > { %p4030_p1 = pnand %p4028_p0, %p4025_p13 }
  0x95   : > { %4033 = shalt.err (!%p4030_p1)
}
  0x96   : > { %s4034_s2 = scalar_lea.vmem %s608_s17, 2048  ;;  %p4042_p9 = scmp.lt.s32.totalorder %s608_s17, %s608_s17 }
  0x97   : > { %p4035_p4 = scmp.ne.s32.totalorder %s608_s17, %s4034_s2  ;;  %p4043_p10 = scmp.lt.s32.totalorder %s4034_s2, %s4034_s2 }
  0x99   : > { %p4037_p6 = pnand %p4035_p4, %p4437_p7  ;;  %p4044_p11 = por %p4043_p10, %p4042_p9 }
  0x9b   : > { %p4038_p8 = pneg %p4037_p6 }
  0x9d   : > { %p4045_p12 = pnand %p4044_p11, %p4038_p8 }
  0x9f   : > { %4048 = shalt.err (!%p4045_p12)
}
  0xa0   : > { %3754 = dma.hbm_to_vmem [thread:$0]  (!%p4421_p5), %s5003_s13, 2048, %s608_s17, [#allocation20], %s5018_s25, %s5018_s25, %s5019_s30  }
  0xa1   : > { %s4289_s20 = smov [#allocation2]   ;;  %s5034_s26 = sld [smem:[#allocation31_spill]] }
  0xa2   : > { %s461_s29 = sshll.u32 %s4289_s20, 4  ;;  %s462_s29 = int_to_ptr.vmem [resolvable:$true] %s461_s29 }
  0xa7   : > { %s4049_s1 = scalar_lea.hbm %s5034_s26, 1024 }
  0xa8   : > { %p4050_p2 = scmp.ne.s32.totalorder %s5034_s26, %s4049_s1  ;;  %p4056_p0 = scmp.lt.u32.totalorder %s4049_s1, %s5034_s26 }
  0xaa   : > { %p4052_p3 = pnand %p4050_p2, %p4437_p7 }
  0xac   : > { %p4053_p13 = pneg %p4052_p3 }
  0xae   : > { %p4058_p1 = pnand %p4056_p0, %p4053_p13 }
  0xb0   : > { %4061 = shalt.err (!%p4058_p1)
}
  0xb1   : > { %s4062_s17 = scalar_lea.vmem %s462_s29, 1024  ;;  %p4070_p9 = scmp.lt.s32.totalorder %s462_s29, %s462_s29 }
  0xb2   : > { %p4063_p4 = scmp.ne.s32.totalorder %s462_s29, %s4062_s17  ;;  %p4071_p10 = scmp.lt.s32.totalorder %s4062_s17, %s4062_s17 }
  0xb4   : > { %p4065_p6 = pnand %p4063_p4, %p4437_p7  ;;  %p4072_p11 = por %p4071_p10, %p4070_p9 }
  0xb6   : > { %p4066_p8 = pneg %p4065_p6 }
  0xb8   : > { %p4073_p12 = pnand %p4072_p11, %p4066_p8 }
  0xba   : > { %4076 = shalt.err (!%p4073_p12)
}
  0xbb   : > { %s4290_s12 = smov 64   ;;  %s4291_s24 = smov 4  }
  0xbc   : > { %3721 = dma.hbm_to_vmem [thread:$0]  (!%p4421_p5), %s5034_s26, 1024, %s462_s29, [#allocation3], %s4290_s12, %s4290_s12, %s4291_s24  }
  0xbd   : > { %s4292_s27 = smov [#allocation6]   ;;  %s4293_s22 = smov [#allocation9]  }
  0xbe   : > { %s487_s1 = sshll.u32 %s4292_s27, 4  ;;  %s513_s23 = sshll.u32 %s4293_s22, 4  ;;  %s488_s1 = int_to_ptr.vmem [resolvable:$true] %s487_s1  ;;  %s4598_s23 = int_to_ptr.vmem [resolvable:$true] %s513_s23 }
  0xbf   : > { %s4077_s17 = scalar_lea.hbm %s4993_s3, 1024 }
  0xc0   : > { %p4078_p2 = scmp.ne.s32.totalorder %s4993_s3, %s4077_s17  ;;  %p4084_p0 = scmp.lt.u32.totalorder %s4077_s17, %s4993_s3 }
  0xc2   : > { %p4080_p3 = pnand %p4078_p2, %p4437_p7 }
  0xc4   : > { %p4081_p13 = pneg %p4080_p3 }
  0xc6   : > { %p4086_p1 = pnand %p4084_p0, %p4081_p13 }
  0xc8   : > { %4089 = shalt.err (!%p4086_p1)
}
  0xc9   : > { %s4090_s14 = scalar_lea.vmem %s488_s1, 1024  ;;  %p4098_p9 = scmp.lt.s32.totalorder %s488_s1, %s488_s1 }
  0xca   : > { %p4091_p4 = scmp.ne.s32.totalorder %s488_s1, %s4090_s14  ;;  %p4099_p10 = scmp.lt.s32.totalorder %s4090_s14, %s4090_s14 }
  0xcc   : > { %p4093_p6 = pnand %p4091_p4, %p4437_p7  ;;  %p4100_p11 = por %p4099_p10, %p4098_p9 }
  0xce   : > { %p4094_p8 = pneg %p4093_p6 }
  0xd0   : > { %p4101_p12 = pnand %p4100_p11, %p4094_p8 }
  0xd2   : > { %4104 = shalt.err (!%p4101_p12)
}
  0xd3   : > { %3727 = dma.hbm_to_vmem [thread:$0]  (!%p4421_p5), %s4993_s3, 1024, %s488_s1, [#allocation5], %s4290_s12, %s4290_s12, %s4291_s24  }
  0xd4   : > { %s4105_s18 = scalar_lea.hbm %s4995_s5, 1024 }
  0xd5   : > { %p4106_p2 = scmp.ne.s32.totalorder %s4995_s5, %s4105_s18  ;;  %p4112_p0 = scmp.lt.u32.totalorder %s4105_s18, %s4995_s5 }
  0xd7   : > { %p4108_p3 = pnand %p4106_p2, %p4437_p7 }
  0xd9   : > { %p4109_p13 = pneg %p4108_p3 }
  0xdb   : > { %p4114_p1 = pnand %p4112_p0, %p4109_p13 }
  0xdd   : > { %4117 = shalt.err (!%p4114_p1)
}
  0xde   : > { %s4118_s1 = scalar_lea.vmem %s4598_s23, 1024  ;;  %p4126_p9 = scmp.lt.s32.totalorder %s4598_s23, %s4598_s23 }
  0xdf   : > { %p4119_p4 = scmp.ne.s32.totalorder %s4598_s23, %s4118_s1  ;;  %p4127_p10 = scmp.lt.s32.totalorder %s4118_s1, %s4118_s1 }
  0xe1   : > { %p4121_p6 = pnand %p4119_p4, %p4437_p7  ;;  %p4128_p11 = por %p4127_p10, %p4126_p9 }
  0xe3   : > { %p4122_p8 = pneg %p4121_p6 }
  0xe5   : > { %p4129_p12 = pnand %p4128_p11, %p4122_p8 }
  0xe7   : > { %4132 = shalt.err (!%p4129_p12)
}
  0xe8   : > { %3733 = dma.hbm_to_vmem [thread:$0]  (!%p4421_p5), %s4995_s5, 1024, %s4598_s23, [#allocation8], %s4290_s12, %s4290_s12, %s4291_s24  }
  0xe9   : > { %s4294_s30 = smov [#allocation12]   ;;  %s4295_s22 = smov [#allocation15]  }
  0xea   : > { %s539_s27 = sshll.u32 %s4294_s30, 4  ;;  %s565_s18 = sshll.u32 %s4295_s22, 4  ;;  %s540_s27 = int_to_ptr.vmem [resolvable:$true] %s539_s27  ;;  %s4647_s18 = int_to_ptr.vmem [resolvable:$true] %s565_s18 }
  0xeb   : > { %s4133_s20 = scalar_lea.hbm %s4997_s7, 1024 }
  0xec   : > { %p4134_p2 = scmp.ne.s32.totalorder %s4997_s7, %s4133_s20  ;;  %p4140_p0 = scmp.lt.u32.totalorder %s4133_s20, %s4997_s7 }
  0xee   : > { %p4136_p3 = pnand %p4134_p2, %p4437_p7 }
  0xf0   : > { %p4137_p13 = pneg %p4136_p3 }
  0xf2   : > { %p4142_p1 = pnand %p4140_p0, %p4137_p13 }
  0xf4   : > { %4145 = shalt.err (!%p4142_p1)
}
  0xf5   : > { %s4146_s25 = scalar_lea.vmem %s540_s27, 1024  ;;  %p4154_p9 = scmp.lt.s32.totalorder %s540_s27, %s540_s27 }
  0xf6   : > { %p4147_p4 = scmp.ne.s32.totalorder %s540_s27, %s4146_s25  ;;  %p4155_p10 = scmp.lt.s32.totalorder %s4146_s25, %s4146_s25 }
  0xf8   : > { %p4149_p6 = pnand %p4147_p4, %p4437_p7  ;;  %p4156_p11 = por %p4155_p10, %p4154_p9 }
  0xfa   : > { %p4150_p8 = pneg %p4149_p6 }
  0xfc   : > { %p4157_p12 = pnand %p4156_p11, %p4150_p8 }
  0xfe   : > { %4160 = shalt.err (!%p4157_p12)
}
  0xff   : > { %3739 = dma.hbm_to_vmem [thread:$0]  (!%p4421_p5), %s4997_s7, 1024, %s540_s27, [#allocation11], %s4290_s12, %s4290_s12, %s4291_s24  }
 0x100   : > { %s4161_s20 = scalar_lea.hbm %s4999_s9, 1024 }
 0x101   : > { %p4162_p2 = scmp.ne.s32.totalorder %s4999_s9, %s4161_s20  ;;  %p4168_p0 = scmp.lt.u32.totalorder %s4161_s20, %s4999_s9 }
 0x103   : > { %p4164_p3 = pnand %p4162_p2, %p4437_p7 }
 0x105   : > { %p4165_p13 = pneg %p4164_p3 }
 0x107   : > { %p4170_p1 = pnand %p4168_p0, %p4165_p13 }
 0x109   : > { %4173 = shalt.err (!%p4170_p1)
}
 0x10a   : > { %s4174_s27 = scalar_lea.vmem %s4647_s18, 1024  ;;  %p4182_p9 = scmp.lt.s32.totalorder %s4647_s18, %s4647_s18 }
 0x10b   : > { %p4175_p4 = scmp.ne.s32.totalorder %s4647_s18, %s4174_s27  ;;  %p4183_p10 = scmp.lt.s32.totalorder %s4174_s27, %s4174_s27 }
 0x10d   : > { %p4177_p6 = pnand %p4175_p4, %p4437_p7  ;;  %p4184_p11 = por %p4183_p10, %p4182_p9 }
 0x10f   : > { %p4178_p8 = pneg %p4177_p6 }
 0x111   : > { %p4185_p12 = pnand %p4184_p11, %p4178_p8 }
 0x113   : > { %4188 = shalt.err (!%p4185_p12)
}
 0x114   : > { %3745 = dma.hbm_to_vmem [thread:$0]  (!%p4421_p5), %s4999_s9, 1024, %s4647_s18, [#allocation14], %s4290_s12, %s4290_s12, %s4291_s24  }
 0x115   : > { %s4296_s22 = smov [#allocation18]   ;;  %s4297_s17 = smov [#allocation21]  }
 0x116   : > { %s591_s2 = sshll.u32 %s4296_s22, 4  ;;  %s623_s20 = sshll.u32 %s4297_s17, 4  ;;  %s592_s2 = int_to_ptr.vmem [resolvable:$true] %s591_s2  ;;  %s4696_s20 = int_to_ptr.vmem [resolvable:$true] %s623_s20 }
 0x117   : > { %s4189_s14 = scalar_lea.hbm %s5001_s11, 1024 }
 0x118   : > { %p4190_p2 = scmp.ne.s32.totalorder %s5001_s11, %s4189_s14  ;;  %p4196_p0 = scmp.lt.u32.totalorder %s4189_s14, %s5001_s11 }
 0x11a   : > { %p4192_p3 = pnand %p4190_p2, %p4437_p7 }
 0x11c   : > { %p4193_p13 = pneg %p4192_p3 }
 0x11e   : > { %p4198_p1 = pnand %p4196_p0, %p4193_p13 }
 0x120   : > { %4201 = shalt.err (!%p4198_p1)
}
 0x121   : > { %s4202_s30 = scalar_lea.vmem %s592_s2, 1024  ;;  %p4210_p9 = scmp.lt.s32.totalorder %s592_s2, %s592_s2 }
 0x122   : > { %p4203_p4 = scmp.ne.s32.totalorder %s592_s2, %s4202_s30  ;;  %p4211_p10 = scmp.lt.s32.totalorder %s4202_s30, %s4202_s30 }
 0x124   : > { %p4205_p6 = pnand %p4203_p4, %p4437_p7  ;;  %p4212_p11 = por %p4211_p10, %p4210_p9 }
 0x126   : > { %p4206_p8 = pneg %p4205_p6 }
 0x128   : > { %p4213_p12 = pnand %p4212_p11, %p4206_p8 }
 0x12a   : > { %4216 = shalt.err (!%p4213_p12)
}
 0x12b   : > { %3751 = dma.hbm_to_vmem [thread:$0]  (!%p4421_p5), %s5001_s11, 1024, %s592_s2, [#allocation17], %s4290_s12, %s4290_s12, %s4291_s24  }
 0x12c   : > { %s4217_s14 = scalar_lea.hbm %s5005_s15, 2048 }
 0x12d   : > { %p4218_p2 = scmp.ne.s32.totalorder %s5005_s15, %s4217_s14  ;;  %p4224_p0 = scmp.lt.u32.totalorder %s4217_s14, %s5005_s15 }
 0x12f   : > { %p4220_p3 = pnand %p4218_p2, %p4437_p7 }
 0x131   : > { %p4221_p13 = pneg %p4220_p3 }
 0x133   : > { %p4226_p1 = pnand %p4224_p0, %p4221_p13 }
 0x135   : > { %4229 = shalt.err (!%p4226_p1)
}
 0x136   : > { %s4230_s12 = scalar_lea.vmem %s4696_s20, 2048  ;;  %p4238_p9 = scmp.lt.s32.totalorder %s4696_s20, %s4696_s20 }
 0x137   : > { %p4231_p4 = scmp.ne.s32.totalorder %s4696_s20, %s4230_s12  ;;  %p4239_p10 = scmp.lt.s32.totalorder %s4230_s12, %s4230_s12 }
 0x139   : > { %p4233_p6 = pnand %p4231_p4, %p4437_p7  ;;  %p4240_p11 = por %p4239_p10, %p4238_p9 }
 0x13b   : > { %p4234_p8 = pneg %p4233_p6 }
 0x13d   : > { %p4241_p12 = pnand %p4240_p11, %p4234_p8 }
 0x13f   : > { %4244 = shalt.err (!%p4241_p12)
}
 0x140   : > { %s5035_s24 = smov 8   ;;  %s5036_s2 = smov 128  }
 0x141   : > { %3757 = dma.hbm_to_vmem [thread:$0]  (!%p4421_p5), %s5005_s15, 2048, %s4696_s20, [#allocation20], %s5036_s2, %s5036_s2, %s5035_s24  }
 0x142   : > { %p5037_p2 = scmp.ne.s32.totalorder %s5030_s19, 0 }
 0x143   : > { %p5038_p7 = scmp.ne.s32.totalorder (!%p5037_p2), %s5029_s0, 0 }
 0x144   : > { %654 = sbr.rel (%p5037_p2) target bundleno = 2564 (0xa04), region = 92 }
 0x14b   : > { %4250 = dma.done.wait (%p5038_p7), [#allocation3], 1024  }
 0x14c   : > { %4252 = vsyncadd (%p5038_p7), [#allocation3], 4294966272 }
 0x14d   : > { %4254 = dma.done.wait (%p5038_p7), [#allocation5], 3072  }
 0x14e   : > { %4256 = vsyncadd (%p5038_p7), [#allocation5], 4294964224 }
 0x14f   : > { %4258 = dma.done.wait (%p5038_p7), [#allocation8], 3072  }
 0x150   : > { %4260 = vsyncadd (%p5038_p7), [#allocation8], 4294964224 }
 0x151   : > { %4262 = dma.done.wait (%p5038_p7), [#allocation11], 3072  }
 0x152   : > { %4264 = vsyncadd (%p5038_p7), [#allocation11], 4294964224 }
 0x153   : > { %4266 = dma.done.wait (%p5038_p7), [#allocation14], 3072  }
 0x154   : > { %4268 = vsyncadd (%p5038_p7), [#allocation14], 4294964224 }
 0x155   : > { %4270 = dma.done.wait (%p5038_p7), [#allocation17], 3072  }
 0x156   : > { %4272 = vsyncadd (%p5038_p7), [#allocation17], 4294964224 }
 0x157   : > { %4274 = dma.done.wait (%p5038_p7), [#allocation20], 4096  }
 0x158   : > { %4276 = vsyncadd (%p5038_p7), [#allocation20], 4294963200  ;;  %s5039_s16 = sld [smem:[#allocation29_spill]]  ;;  %v4298_v0 = vmov 0   ;;  %v789_v1 = vld [vmem:[#allocation4 + $0x10] sm:$0xff]  ;;  %v787_v2 = vld [vmem:[#allocation4] sm:$0xff] }
 0x159   : > { %3812 = vset.pattern.permute.xlu1 %v4298_v0  ;;  %3811 = vset.pattern.permute.xlu0 %v4298_v0  ;;  %s5041_s29 = sld [smem:[#allocation30_spill]]  ;;  %vm948_vm0 = vcmask 1043456   ;;  %v790_v7 = vld [vmem:[#allocation4 + $0x18] sm:$0xff]  ;;  %v788_v8 = vld [vmem:[#allocation4 + $0x8] sm:$0xff]  ;;  %v3813_v10 = vld [vmem:[#allocation2] sm:$0xff]   ;;  %vm923_vm1 = vcmask 64512  }
 0x15a   : > { %987 = vmatprep.mubr.bf16.mxu0 %v4298_v0  ;;  %1308 = vmatprep.mubr.bf16.mxu1 %v4298_v0  ;;  %v792_v11 = vld [vmem:[#allocation4 + $0x28] sm:$0xff]  ;;  %v791_v12 = vld [vmem:[#allocation4 + $0x20] sm:$0xff]  ;;  %v794_v13 = vld [vmem:[#allocation4 + $0x38] sm:$0xff]  ;;  %s5042_s27 = sld [smem:[#allocation36_spill]]  ;;  %s5043_s12 = sld [smem:[#allocation33_spill]] }
 0x15b   : > { %815 = vperm.xlu1 %3812, %v789_v1   ;;  %805 = vperm.xlu0 %3811, %v787_v2   ;;  %v793_v14 = vld [vmem:[#allocation4 + $0x30] sm:$0xff]  ;;  %v3814_v15 = vld [vmem:[#allocation2 + $0x8] sm:$0xff]   ;;  %v795_v17 = vld [vmem:[#allocation4 + $0x40] sm:$0xff]  ;;  %s5044_s24 = sld [smem:[#allocation34_spill]]  ;;  %s5045_s30 = sld [smem:[#allocation35_spill]] }
 0x15c   : > { %v796_v16 = vld [vmem:[#allocation4 + $0x48] sm:$0xff]  ;;  %v798_v18 = vld [vmem:[#allocation4 + $0x58] sm:$0xff]  ;;  %v797_v19 = vld [vmem:[#allocation4 + $0x50] sm:$0xff] }
 0x15d   : > { %v3815_v20 = vld [vmem:[#allocation2 + $0x10] sm:$0xff]   ;;  %v800_v21 = vld [vmem:[#allocation4 + $0x68] sm:$0xff]  ;;  %v799_v22 = vld [vmem:[#allocation4 + $0x60] sm:$0xff] }
 0x15e   : > { %s5040_s19 = sadd.s32 4294967295, %s5039_s16   ;;  %v802_v23 = vld [vmem:[#allocation4 + $0x78] sm:$0xff]  ;;  %v801_v24 = vld [vmem:[#allocation4 + $0x70] sm:$0xff]  ;;  %v1133_v26 = vld [vmem:[#allocation7 + $0x8] sm:$0xff] }
 0x15f   : > { %s3547_s21 = sshll.u32 %s5040_s19, 1  ;;  %820 = vperm.xlu1 %3812, %v790_v7   ;;  %810 = vperm.xlu0 %3811, %v788_v8   ;;  %v3816_v25 = vld [vmem:[#allocation2 + $0x18] sm:$0xff]   ;;  %v1132_v27 = vld [vmem:[#allocation7] sm:$0xff]  ;;  %v1134_v29 = vld [vmem:[#allocation7 + $0x10] sm:$0xff]  ;;  %s5046_s19 = sld [smem:[#allocation37_spill]] }
 0x160   : > { %p756_p5 = scmp.lt.s32.totalorder %s3547_s21, 7  ;;  %v1135_v28 = vld [vmem:[#allocation7 + $0x18] sm:$0xff]  ;;  %v3817_v30 = vld [vmem:[#allocation2 + $0x20] sm:$0xff]   ;;  %v1137_v31 = vld [vmem:[#allocation7 + $0x28] sm:$0xff] }
 0x161   : > { %v1136_v32 = vld [vmem:[#allocation7 + $0x20] sm:$0xff]  ;;  %v1139_v33 = vld [vmem:[#allocation7 + $0x38] sm:$0xff]  ;;  %v1138_v34 = vld [vmem:[#allocation7 + $0x30] sm:$0xff] }
 0x162   : > { %s5049_s21 = smov (!%p756_p5, %s3547_s21), 7  ;;  %v3818_v35 = vld [vmem:[#allocation2 + $0x28] sm:$0xff]   ;;  %v1140_v37 = vld [vmem:[#allocation7 + $0x40] sm:$0xff]  ;;  %v1143_v38 = vld [vmem:[#allocation7 + $0x58] sm:$0xff] }
 0x163   : > { %s3548_s20 = sshll.u32 %s5049_s21, 3  ;;  %830 = vperm.xlu1 %3812, %v792_v11   ;;  %825 = vperm.xlu0 %3811, %v791_v12   ;;  %v1141_v36 = vld [vmem:[#allocation7 + $0x48] sm:$0xff]  ;;  %v1142_v39 = vld [vmem:[#allocation7 + $0x50] sm:$0xff]  ;;  %v1144_v42 = vld [vmem:[#allocation7 + $0x60] sm:$0xff] }
 0x164   : > { %s759_s1 = scalar_lea.vmem %s5041_s29, %s3548_s20  ;;  %v3819_v40 = vld [vmem:[#allocation2 + $0x30] sm:$0xff]   ;;  %v1145_v41 = vld [vmem:[#allocation7 + $0x68] sm:$0xff]  ;;  %v1147_v43 = vld [vmem:[#allocation7 + $0x78] sm:$0xff] }
 0x165   : > { %v768_v3 = vld [vmem:[%s759_s1 + $0x8] sm:$0xff]  ;;  %v767_v5 = vld [vmem:[%s759_s1] sm:$0xff]  ;;  %v1146_v44 = vld [vmem:[#allocation7 + $0x70] sm:$0xff]  ;;  %s764_s20 = scalar_lea.vmem %s5046_s19, %s5049_s21 }
 0x166   : > { %v4787_v4 = vpack.c.bf16 %v768_v3, %v768_v3  ;;  %v769_v6 = vpack.c.bf16 %v767_v5, %v767_v5  ;;  %v3820_v45 = vld [vmem:[#allocation2 + $0x38] sm:$0xff]   ;;  %v1454_v46 = vld [vmem:[#allocation10 + $0x8] sm:$0xff]  ;;  %v1453_v47 = vld [vmem:[#allocation10] sm:$0xff] }
 0x167   : > { %840 = vperm.xlu1 %3812, %v794_v13   ;;  %835 = vperm.xlu0 %3811, %v793_v14   ;;  %v1456_v48 = vld [vmem:[#allocation10 + $0x18] sm:$0xff]  ;;  %v1455_v49 = vld [vmem:[#allocation10 + $0x10] sm:$0xff]  ;;  %v1458_v50 = vld [vmem:[#allocation10 + $0x28] sm:$0xff] }
 0x168   : > { %3558 = vmatprep.subr.msk.bf16.mxu0 %vm948_vm0, %v4787_v4  ;;  %v4792_v9 = vsel %vm948_vm0, %v769_v6, 0  ;;  %v1457_v51 = vld [vmem:[#allocation10 + $0x20] sm:$0xff]  ;;  %v1460_v52 = vld [vmem:[#allocation10 + $0x38] sm:$0xff]  ;;  %v1459_v53 = vld [vmem:[#allocation10 + $0x30] sm:$0xff] }
 0x169   : > { %956 = vmatpush1.bf16.msra.mxu0 %v4792_v9  ;;  %v1462_v54 = vld [vmem:[#allocation10 + $0x48] sm:$0xff]  ;;  %v1461_v55 = vld [vmem:[#allocation10 + $0x40] sm:$0xff]  ;;  %v1464_v56 = vld [vmem:[#allocation10 + $0x58] sm:$0xff] }
 0x16a   : > { %v1463_v57 = vld [vmem:[#allocation10 + $0x50] sm:$0xff]  ;;  %v1466_v58 = vld [vmem:[#allocation10 + $0x68] sm:$0xff]  ;;  %v1465_v59 = vld [vmem:[#allocation10 + $0x60] sm:$0xff] }
 0x16b   : > { %850 = vperm.xlu1 %3812, %v796_v16   ;;  %845 = vperm.xlu0 %3811, %v795_v17   ;;  %v1468_v60 = vld [vmem:[#allocation10 + $0x78] sm:$0xff]  ;;  %v1467_v61 = vld [vmem:[#allocation10 + $0x70] sm:$0xff]  ;;  %v1775_v62 = vld [vmem:[#allocation13 + $0x8] sm:$0xff] }
 0x16c   : > { %3559 = vmatmul.mubr.msk.bf16.vlgmr.msra.gmra.mrb[0].mxu0 %vm923_vm1, %v3813_v10  ;;  %v1774_v63 = vld [vmem:[#allocation13] sm:$0xff]  ;;  %v1777_v1 = vld [vmem:[#allocation13 + $0x18] sm:$0xff]  ;;  %v1776_v2 = vld [vmem:[#allocation13 + $0x10] sm:$0xff] }
 0x16d   : > { %997 = vmatprep.mubr.bf16.mxu0 %v4298_v0  ;;  %v1779_v3 = vld [vmem:[#allocation13 + $0x28] sm:$0xff]  ;;  %v1778_v5 = vld [vmem:[#allocation13 + $0x20] sm:$0xff]  ;;  %v1781_v6 = vld [vmem:[#allocation13 + $0x38] sm:$0xff] }
 0x16e   : > { %v1780_v7 = vld [vmem:[#allocation13 + $0x30] sm:$0xff]  ;;  %v1783_v8 = vld [vmem:[#allocation13 + $0x48] sm:$0xff]  ;;  %v1782_v10 = vld [vmem:[#allocation13 + $0x40] sm:$0xff] }
 0x16f   : > { %860 = vperm.xlu1 %3812, %v798_v18   ;;  %855 = vperm.xlu0 %3811, %v797_v19   ;;  %v1785_v11 = vld [vmem:[#allocation13 + $0x58] sm:$0xff]  ;;  %v1784_v12 = vld [vmem:[#allocation13 + $0x50] sm:$0xff]  ;;  %v1787_v13 = vld [vmem:[#allocation13 + $0x68] sm:$0xff] }
 0x170   : > { %v1786_v14 = vld [vmem:[#allocation13 + $0x60] sm:$0xff]  ;;  %v1788_v16 = vld [vmem:[#allocation13 + $0x70] sm:$0xff]  ;;  %v2096_v17 = vld [vmem:[#allocation16 + $0x8] sm:$0xff] }
 0x171   : > { %v2095_v18 = vld [vmem:[#allocation16] sm:$0xff]  ;;  %v2098_v19 = vld [vmem:[#allocation16 + $0x18] sm:$0xff] }
 0x173   : > { %870 = vperm.xlu1 %3812, %v800_v21   ;;  %865 = vperm.xlu0 %3811, %v799_v22   ;;  %v2100_v21 = vld [vmem:[#allocation16 + $0x28] sm:$0xff]  ;;  %v2099_v22 = vld [vmem:[#allocation16 + $0x20] sm:$0xff] }
 0x174   : > { %3560 = vmatmul.mubr.msk.bf16.gmra.mrb[4].mxu0 %vm923_vm1, %v3814_v15  ;;  %v1789_v15 = vld [vmem:[#allocation13 + $0x78] sm:$0xff] }
 0x175   : > { %1007 = vmatprep.mubr.bf16.mxu0 %v4298_v0 }
 0x177   : > { %880 = vperm.xlu1 %3812, %v802_v23   ;;  %875 = vperm.xlu0 %3811, %v801_v24   ;;  %v2102_v23 = vld [vmem:[#allocation16 + $0x38] sm:$0xff]  ;;  %v2101_v24 = vld [vmem:[#allocation16 + $0x30] sm:$0xff] }
 0x17b   : > { %1155 = vperm.xlu1 %3812, %v1133_v26   ;;  %1150 = vperm.xlu0 %3811, %v1132_v27   ;;  %v2103_v26 = vld [vmem:[#allocation16 + $0x40] sm:$0xff]  ;;  %v2106_v27 = vld [vmem:[#allocation16 + $0x58] sm:$0xff] }
 0x17c   : > { %3561 = vmatmul.mubr.msk.bf16.gmra.mrb[8].mxu0 %vm923_vm1, %v3815_v20  ;;  %v2097_v20 = vld [vmem:[#allocation16 + $0x10] sm:$0xff] }
 0x17d   : > { %1017 = vmatprep.mubr.bf16.mxu0 %v4298_v0 }
 0x17f   : > { %1165 = vperm.xlu1 %3812, %v1135_v28   ;;  %1160 = vperm.xlu0 %3811, %v1134_v29   ;;  %v2105_v28 = vld [vmem:[#allocation16 + $0x50] sm:$0xff]  ;;  %v2108_v29 = vld [vmem:[#allocation16 + $0x68] sm:$0xff] }
 0x183   : > { %1175 = vperm.xlu1 %3812, %v1137_v31   ;;  %1170 = vperm.xlu0 %3811, %v1136_v32   ;;  %v2110_v31 = vld [vmem:[#allocation16 + $0x78] sm:$0xff]  ;;  %v2109_v32 = vld [vmem:[#allocation16 + $0x70] sm:$0xff] }
 0x184   : > { %3562 = vmatmul.mubr.msk.bf16.gmra.mrb[12].mxu0 %vm923_vm1, %v3816_v25  ;;  %v2104_v25 = vld [vmem:[#allocation16 + $0x48] sm:$0xff] }
 0x185   : > { %1027 = vmatprep.mubr.bf16.mxu0 %v4298_v0 }
 0x187   : > { %1185 = vperm.xlu1 %3812, %v1139_v33   ;;  %1180 = vperm.xlu0 %3811, %v1138_v34   ;;  %v2771_v33 = vld [vmem:[#allocation19 + $0x8] sm:$0xff]  ;;  %v2770_v34 = vld [vmem:[#allocation19] sm:$0xff] }
 0x18b   : > { %1195 = vperm.xlu1 %3812, %v1141_v36   ;;  %1190 = vperm.xlu0 %3811, %v1140_v37   ;;  %v2772_v36 = vld [vmem:[#allocation19 + $0x10] sm:$0xff]  ;;  %v2775_v37 = vld [vmem:[#allocation19 + $0x28] sm:$0xff] }
 0x18c   : > { %3563 = vmatmul.mubr.msk.bf16.gmra.mrb[16].mxu0 %vm923_vm1, %v3817_v30  ;;  %v2107_v30 = vld [vmem:[#allocation16 + $0x60] sm:$0xff] }
 0x18d   : > { %1037 = vmatprep.mubr.bf16.mxu0 %v4298_v0 }
 0x18f   : > { %1205 = vperm.xlu1 %3812, %v1143_v38   ;;  %1200 = vperm.xlu0 %3811, %v1142_v39   ;;  %v2774_v38 = vld [vmem:[#allocation19 + $0x20] sm:$0xff]  ;;  %v2777_v39 = vld [vmem:[#allocation19 + $0x38] sm:$0xff] }
 0x193   : > { %1215 = vperm.xlu1 %3812, %v1145_v41   ;;  %1210 = vperm.xlu0 %3811, %v1144_v42   ;;  %v2779_v41 = vld [vmem:[#allocation19 + $0x48] sm:$0xff]  ;;  %v2778_v42 = vld [vmem:[#allocation19 + $0x40] sm:$0xff] }
 0x194   : > { %3564 = vmatmul.mubr.msk.bf16.gmra.mrb[20].mxu0 %vm923_vm1, %v3818_v35  ;;  %v2773_v35 = vld [vmem:[#allocation19 + $0x18] sm:$0xff] }
 0x195   : > { %1047 = vmatprep.mubr.bf16.mxu0 %v4298_v0 }
 0x197   : > { %1225 = vperm.xlu1 %3812, %v1147_v43   ;;  %1220 = vperm.xlu0 %3811, %v1146_v44   ;;  %v2781_v43 = vld [vmem:[#allocation19 + $0x58] sm:$0xff]  ;;  %v2780_v44 = vld [vmem:[#allocation19 + $0x50] sm:$0xff] }
 0x19b   : > { %1476 = vperm.xlu1 %3812, %v1454_v46   ;;  %1471 = vperm.xlu0 %3811, %v1453_v47   ;;  %v2782_v46 = vld [vmem:[#allocation19 + $0x60] sm:$0xff] }
 0x19c   : > { %3565 = vmatmul.mubr.msk.bf16.gmra.mrb[24].mxu0 %vm923_vm1, %v3819_v40  ;;  %v2776_v40 = vld [vmem:[#allocation19 + $0x30] sm:$0xff] }
 0x19d   : > { %1057 = vmatprep.mubr.bf16.mxu0 %v4298_v0 }
 0x19f   : > { %1486 = vperm.xlu1 %3812, %v1456_v48   ;;  %1481 = vperm.xlu0 %3811, %v1455_v49   ;;  %v2785_v49 = vld [vmem:[#allocation19 + $0x78] sm:$0xff] }
 0x1a3   : > { %1496 = vperm.xlu1 %3812, %v1458_v50   ;;  %1491 = vperm.xlu0 %3811, %v1457_v51   ;;  %v2784_v50 = vld [vmem:[#allocation19 + $0x70] sm:$0xff] }
 0x1a4   : > { %3566 = vmatmul.mubr.msk.bf16.gmra.mrb[28].mxu0 %vm923_vm1, %v3820_v45  ;;  %v2783_v45 = vld [vmem:[#allocation19 + $0x68] sm:$0xff] }
 0x1a5   : > { %1629 = vmatprep.mubr.bf16.mxu0 %v4298_v0 }
 0x1a7   : > { %1506 = vperm.xlu1 %3812, %v1460_v52   ;;  %1501 = vperm.xlu0 %3811, %v1459_v53   ;;  %v2963_v52 = vld [vmem:[#allocation21 + $0x8] sm:$0xff] }
 0x1ab   : > { %1516 = vperm.xlu1 %3812, %v1462_v54   ;;  %1511 = vperm.xlu0 %3811, %v1461_v55   ;;  %v2962_v54 = vld [vmem:[#allocation21] sm:$0xff]  ;;  %v2965_v55 = vld [vmem:[#allocation21 + $0x18] sm:$0xff] }
 0x1af   : > { %1526 = vperm.xlu1 %3812, %v1464_v56   ;;  %1521 = vperm.xlu0 %3811, %v1463_v57   ;;  %v2964_v56 = vld [vmem:[#allocation21 + $0x10] sm:$0xff] }
 0x1b3   : > { %1536 = vperm.xlu1 %3812, %v1466_v58   ;;  %1531 = vperm.xlu0 %3811, %v1465_v59   ;;  %v2967_v59 = vld [vmem:[#allocation21 + $0x28] sm:$0xff] }
 0x1b7   : > { %1546 = vperm.xlu1 %3812, %v1468_v60   ;;  %1541 = vperm.xlu0 %3811, %v1467_v61   ;;  %v2966_v60 = vld [vmem:[#allocation21 + $0x20] sm:$0xff] }
 0x1bb   : > { %1797 = vperm.xlu1 %3812, %v1775_v62   ;;  %1792 = vperm.xlu0 %3811, %v1774_v63   ;;  %v2969_v62 = vld [vmem:[#allocation21 + $0x38] sm:$0xff] }
 0x1bf   : > { %1807 = vperm.xlu1 %3812, %v1777_v1   ;;  %1802 = vperm.xlu0 %3811, %v1776_v2   ;;  %v2968_v1 = vld [vmem:[#allocation21 + $0x30] sm:$0xff]  ;;  %v2971_v2 = vld [vmem:[#allocation21 + $0x48] sm:$0xff] }
 0x1c3   : > { %1817 = vperm.xlu1 %3812, %v1779_v3   ;;  %1812 = vperm.xlu0 %3811, %v1778_v5   ;;  %v2970_v3 = vld [vmem:[#allocation21 + $0x40] sm:$0xff] }
 0x1c7   : > { %1827 = vperm.xlu1 %3812, %v1781_v6   ;;  %1822 = vperm.xlu0 %3811, %v1780_v7   ;;  %v2973_v7 = vld [vmem:[#allocation21 + $0x58] sm:$0xff] }
 0x1cb   : > { %1837 = vperm.xlu1 %3812, %v1783_v8   ;;  %1832 = vperm.xlu0 %3811, %v1782_v10   ;;  %v2972_v8 = vld [vmem:[#allocation21 + $0x50] sm:$0xff] }
 0x1cf   : > { %1847 = vperm.xlu1 %3812, %v1785_v11   ;;  %1842 = vperm.xlu0 %3811, %v1784_v12   ;;  %v2975_v11 = vld [vmem:[#allocation21 + $0x68] sm:$0xff] }
 0x1d3   : > { %1857 = vperm.xlu1 %3812, %v1787_v13   ;;  %1852 = vperm.xlu0 %3811, %v1786_v14   ;;  %v2974_v13 = vld [vmem:[#allocation21 + $0x60] sm:$0xff]  ;;  %v2977_v14 = vld [vmem:[#allocation21 + $0x78] sm:$0xff] }
 0x1d7   : > { %1867 = vperm.xlu1 %3812, %v1789_v15   ;;  %1862 = vperm.xlu0 %3811, %v1788_v16   ;;  %v2976_v16 = vld [vmem:[#allocation21 + $0x70] sm:$0xff] }
 0x1da   : > { %v806_v47 = vpop.permute.xlu0 %805  ;;  %v4811_v48 = vpop.permute.xlu1 %815 }
 0x1db   : > { %2118 = vperm.xlu1 %3812, %v2096_v17   ;;  %2113 = vperm.xlu0 %3811, %v2095_v18  }
 0x1de   : > { %v811_v51 = vpop.permute.xlu0 %810  ;;  %v4813_v53 = vpop.permute.xlu1 %820 }
 0x1df   : > { %2128 = vperm.xlu1 %3812, %v2098_v19   ;;  %2123 = vperm.xlu0 %3811, %v2097_v20  }
 0x1e2   : > { %v4815_v57 = vpop.permute.xlu0 %825  ;;  %v4817_v58 = vpop.permute.xlu1 %830 }
 0x1e3   : > { %2138 = vperm.xlu1 %3812, %v2100_v21   ;;  %2133 = vperm.xlu0 %3811, %v2099_v22  }
 0x1e6   : > { %v4819_v61 = vpop.permute.xlu0 %835  ;;  %v4821_v63 = vpop.permute.xlu1 %840 }
 0x1e7   : > { %2148 = vperm.xlu1 %3812, %v2102_v23   ;;  %2143 = vperm.xlu0 %3811, %v2101_v24  }
 0x1ea   : > { %v4823_v5 = vpop.permute.xlu0 %845  ;;  %v4825_v6 = vpop.permute.xlu1 %850 }
 0x1eb   : > { %2158 = vperm.xlu1 %3812, %v2104_v25   ;;  %2153 = vperm.xlu0 %3811, %v2103_v26   ;;  %v3268_v26 = vld [vmem:[%s5042_s27] sm:$0xff] }
 0x1ee   : > { %v4827_v10 = vpop.permute.xlu0 %855  ;;  %v4829_v12 = vpop.permute.xlu1 %860 }
 0x1ef   : > { %2168 = vperm.xlu1 %3812, %v2106_v27   ;;  %2163 = vperm.xlu0 %3811, %v2105_v28  }
 0x1f2   : > { %v4831_v17 = vpop.permute.xlu0 %865  ;;  %v4833_v20 = vpop.permute.xlu1 %870 }
 0x1f3   : > { %2178 = vperm.xlu1 %3812, %v2108_v29   ;;  %2173 = vperm.xlu0 %3811, %v2107_v30  }
 0x1f7   : > { %2188 = vperm.xlu1 %3812, %v2110_v31   ;;  %2183 = vperm.xlu0 %3811, %v2109_v32   ;;  %v4838_v31 = vpop.permute.xlu0 %875 }
 0x1fb   : > { %2793 = vperm.xlu1 %3812, %v2771_v33   ;;  %2788 = vperm.xlu0 %3811, %v2770_v34  }
 0x1ff   : > { %2803 = vperm.xlu1 %3812, %v2773_v35   ;;  %2798 = vperm.xlu0 %3811, %v2772_v36  }
 0x203   : > { %2813 = vperm.xlu1 %3812, %v2775_v37   ;;  %2808 = vperm.xlu0 %3811, %v2774_v38  }
 0x207   : > { %2823 = vperm.xlu1 %3812, %v2777_v39   ;;  %2818 = vperm.xlu0 %3811, %v2776_v40  }
 0x20b   : > { %2833 = vperm.xlu1 %3812, %v2779_v41   ;;  %2828 = vperm.xlu0 %3811, %v2778_v42  }
 0x20f   : > { %2843 = vperm.xlu1 %3812, %v2781_v43   ;;  %2838 = vperm.xlu0 %3811, %v2780_v44  }
 0x213   : > { %2853 = vperm.xlu1 %3812, %v2783_v45   ;;  %2848 = vperm.xlu0 %3811, %v2782_v46  }
 0x217   : > { %2863 = vperm.xlu1 %3812, %v2785_v49   ;;  %2858 = vperm.xlu0 %3811, %v2784_v50  }
 0x21b   : > { %2985 = vperm.xlu1 %3812, %v2963_v52   ;;  %2980 = vperm.xlu0 %3811, %v2962_v54  }
 0x21f   : > { %2995 = vperm.xlu1 %3812, %v2965_v55   ;;  %2990 = vperm.xlu0 %3811, %v2964_v56  }
 0x223   : > { %3005 = vperm.xlu1 %3812, %v2967_v59   ;;  %3000 = vperm.xlu0 %3811, %v2966_v60  }
 0x227   : > { %3015 = vperm.xlu1 %3812, %v2969_v62   ;;  %3010 = vperm.xlu0 %3811, %v2968_v1  }
 0x22b   : > { %3025 = vperm.xlu1 %3812, %v2971_v2   ;;  %3020 = vperm.xlu0 %3811, %v2970_v3  }
 0x22f   : > { %3035 = vperm.xlu1 %3812, %v2973_v7   ;;  %3030 = vperm.xlu0 %3811, %v2972_v8  }
 0x233   : > { %3045 = vperm.xlu1 %3812, %v2975_v11   ;;  %3040 = vperm.xlu0 %3811, %v2974_v13  }
 0x237   : > { %3055 = vperm.xlu1 %3812, %v2977_v14   ;;  %3050 = vperm.xlu0 %3811, %v2976_v16  }
 0x23b   : > { %3271 = vperm.xlu0 %3811, %v3268_v26  }
 0x23f   : > { %v989_v15 = vpop.f32.mrb[0].mxu0 }
 0x240   : > { %v990_v18 = vadd.f32 %v989_v15, %v806_v47  ;;  %v991_v19 = vpop.f32.mrb[1].mxu0 }
 0x241   : > { %v992_v21 = vadd.f32 %v991_v19, %v806_v47  ;;  %v993_v22 = vpop.f32.mrb[2].mxu0 }
 0x242   : > { %v994_v23 = vadd.f32 %v993_v22, %v811_v51  ;;  %v995_v24 = vpop.f32.mrb[3].mxu0  ;;  %v1068_v27 = vmax.f32 %v990_v18, 0.0 }
 0x243   : > { %v996_v25 = vadd.f32 %v995_v24, %v811_v51  ;;  %v1069_v29 = vmax.f32 %v992_v21, 0.0 }
 0x244   : > { %v1070_v28 = vmax.f32 %v994_v23, 0.0 }
 0x245   : > { %v1071_v30 = vmax.f32 %v996_v25, 0.0 }
 0x246   : > { %v1100_v32 = vpack.c.bf16 %v1070_v28, %v1068_v27 }
 0x247   : > { %v999_v33 = vpop.f32.mrb[4].mxu0  ;;  %v1101_v34 = vpack.c.bf16 %v1071_v30, %v1069_v29 }
 0x248   : > { %v1000_v35 = vadd.f32 %v999_v33, %v4811_v48  ;;  %v1001_v36 = vpop.f32.mrb[5].mxu0 }
 0x249   : > { %v1002_v37 = vadd.f32 %v1001_v36, %v4811_v48  ;;  %v1003_v38 = vpop.f32.mrb[6].mxu0  ;;  %1276 = vmatprep.subr.bf16.mxu1 %v1101_v34 }
 0x24a   : > { %v1004_v39 = vadd.f32 %v1003_v38, %v4813_v53  ;;  %v1005_v40 = vpop.f32.mrb[7].mxu0  ;;  %1277 = vmatpush1.bf16.msra.mxu1 %v1100_v32  ;;  %v1072_v42 = vmax.f32 %v1000_v35, 0.0 }
 0x24b   : > { %v1006_v41 = vadd.f32 %v1005_v40, %v4813_v53  ;;  %v1073_v44 = vmax.f32 %v1002_v37, 0.0 }
 0x24c   : > { %v1074_v43 = vmax.f32 %v1004_v39, 0.0 }
 0x24d   : > { %v1075_v45 = vmax.f32 %v1006_v41, 0.0 }
 0x24e   : > { %v1102_v46 = vpack.c.bf16 %v1074_v43, %v1072_v42 }
 0x24f   : > { %v1103_v47 = vpack.c.bf16 %v1075_v45, %v1073_v44  ;;  %v1009_v49 = vpop.f32.mrb[8].mxu0 }
 0x250   : > { %v1010_v50 = vadd.f32 %v1009_v49, %v4815_v57  ;;  %v1011_v51 = vpop.f32.mrb[9].mxu0 }
 0x251   : > { %v1012_v48 = vadd.f32 %v1011_v51, %v4815_v57  ;;  %v1013_v52 = vpop.f32.mrb[10].mxu0  ;;  %1278 = vmatprep.subr.bf16.mxu1 %v1103_v47 }
 0x252   : > { %v1014_v54 = vadd.f32 %v1013_v52, %v4817_v58  ;;  %v1015_v55 = vpop.f32.mrb[11].mxu0  ;;  %1279 = vmatpush1.bf16.msra.mxu1 %v1102_v46  ;;  %v1076_v56 = vmax.f32 %v1010_v50, 0.0 }
 0x253   : > { %v1016_v53 = vadd.f32 %v1015_v55, %v4817_v58  ;;  %v1077_v60 = vmax.f32 %v1012_v48, 0.0 }
 0x254   : > { %v1078_v59 = vmax.f32 %v1014_v54, 0.0 }
 0x255   : > { %v1079_v62 = vmax.f32 %v1016_v53, 0.0 }
 0x256   : > { %v1104_v1 = vpack.c.bf16 %v1078_v59, %v1076_v56 }
 0x257   : > { %v1105_v2 = vpack.c.bf16 %v1079_v62, %v1077_v60  ;;  %v1019_v3 = vpop.f32.mrb[12].mxu0 }
 0x258   : > { %v1020_v7 = vadd.f32 %v1019_v3, %v4819_v61  ;;  %v1021_v8 = vpop.f32.mrb[13].mxu0 }
 0x259   : > { %v1022_v57 = vadd.f32 %v1021_v8, %v4819_v61  ;;  %v1023_v11 = vpop.f32.mrb[14].mxu0  ;;  %1280 = vmatprep.subr.bf16.mxu1 %v1105_v2 }
 0x25a   : > { %v1024_v13 = vadd.f32 %v1023_v11, %v4821_v63  ;;  %v1025_v14 = vpop.f32.mrb[15].mxu0  ;;  %1281 = vmatpush1.bf16.msra.mxu1 %v1104_v1  ;;  %v1080_v15 = vmax.f32 %v1020_v7, 0.0  ;;  %v881_v7 = vpop.permute.xlu1 %880 }
 0x25b   : > { %v1026_v58 = vadd.f32 %v1025_v14, %v4821_v63  ;;  %v1081_v18 = vmax.f32 %v1022_v57, 0.0 }
 0x25c   : > { %v1082_v16 = vmax.f32 %v1024_v13, 0.0 }
 0x25d   : > { %v1083_v19 = vmax.f32 %v1026_v58, 0.0 }
 0x25e   : > { %v1106_v21 = vpack.c.bf16 %v1082_v16, %v1080_v15 }
 0x25f   : > { %v1107_v22 = vpack.c.bf16 %v1083_v19, %v1081_v18  ;;  %v1029_v23 = vpop.f32.mrb[16].mxu0  ;;  %v3821_v19 = vld [vmem:[#allocation6] sm:$0xff]  }
 0x260   : > { %v1030_v24 = vadd.f32 %v1029_v23, %v4823_v5  ;;  %v1031_v25 = vpop.f32.mrb[17].mxu0  ;;  %v3825_v23 = vld [vmem:[#allocation6 + $0x20] sm:$0xff]  }
 0x261   : > { %v1032_v61 = vadd.f32 %v1031_v25, %v4823_v5  ;;  %v1033_v26 = vpop.f32.mrb[18].mxu0  ;;  %1282 = vmatprep.subr.bf16.mxu1 %v1107_v22  ;;  %v3824_v22 = vld [vmem:[#allocation6 + $0x18] sm:$0xff]   ;;  %v3827_v25 = vld [vmem:[#allocation6 + $0x30] sm:$0xff]  }
 0x262   : > { %v1034_v27 = vadd.f32 %v1033_v26, %v4825_v6  ;;  %v1035_v28 = vpop.f32.mrb[19].mxu0  ;;  %1283 = vmatpush1.bf16.msra.mxu1 %v1106_v21  ;;  %v1084_v29 = vmax.f32 %v1030_v24, 0.0  ;;  %v3822_v21 = vld [vmem:[#allocation6 + $0x8] sm:$0xff]   ;;  %v1151_v26 = vpop.permute.xlu0 %1150 }
 0x263   : > { %v1036_v63 = vadd.f32 %v1035_v28, %v4825_v6  ;;  %v1085_v32 = vmax.f32 %v1032_v61, 0.0  ;;  %v3826_v24 = vld [vmem:[#allocation6 + $0x28] sm:$0xff]   ;;  %v3828_v61 = vld [vmem:[#allocation6 + $0x38] sm:$0xff]  }
 0x264   : > { %v1086_v30 = vmax.f32 %v1034_v27, 0.0 }
 0x265   : > { %v1087_v33 = vmax.f32 %v1036_v63, 0.0 }
 0x266   : > { %v1108_v34 = vpack.c.bf16 %v1086_v30, %v1084_v29  ;;  %v1156_v29 = vpop.permute.xlu1 %1155 }
 0x267   : > { %v1109_v35 = vpack.c.bf16 %v1087_v33, %v1085_v32  ;;  %v1039_v36 = vpop.f32.mrb[20].mxu0 }
 0x268   : > { %v1040_v37 = vadd.f32 %v1039_v36, %v4827_v10  ;;  %v1041_v38 = vpop.f32.mrb[21].mxu0 }
 0x269   : > { %v1042_v5 = vadd.f32 %v1041_v38, %v4827_v10  ;;  %v1043_v39 = vpop.f32.mrb[22].mxu0  ;;  %1284 = vmatprep.subr.bf16.mxu1 %v1109_v35 }
 0x26a   : > { %v1044_v40 = vadd.f32 %v1043_v39, %v4829_v12  ;;  %v1045_v41 = vpop.f32.mrb[23].mxu0  ;;  %1285 = vmatpush1.bf16.msra.mxu1 %v1108_v34  ;;  %v1088_v42 = vmax.f32 %v1040_v37, 0.0 }
 0x26b   : > { %v1046_v6 = vadd.f32 %v1045_v41, %v4829_v12  ;;  %v1089_v44 = vmax.f32 %v1042_v5, 0.0 }
 0x26c   : > { %v1090_v43 = vmax.f32 %v1044_v40, 0.0  ;;  %v1161_v40 = vpop.permute.xlu0 %1160 }
 0x26d   : > { %v1091_v45 = vmax.f32 %v1046_v6, 0.0 }
 0x26e   : > { %v1110_v46 = vpack.c.bf16 %v1090_v43, %v1088_v42 }
 0x26f   : > { %v1111_v47 = vpack.c.bf16 %v1091_v45, %v1089_v44  ;;  %v1049_v49 = vpop.f32.mrb[24].mxu0  ;;  %v1166_v44 = vpop.permute.xlu1 %1165 }
 0x270   : > { %v1050_v50 = vadd.f32 %v1049_v49, %v4831_v17  ;;  %v1051_v51 = vpop.f32.mrb[25].mxu0 }
 0x271   : > { %v1052_v10 = vadd.f32 %v1051_v51, %v4831_v17  ;;  %v1053_v48 = vpop.f32.mrb[26].mxu0  ;;  %1286 = vmatprep.subr.bf16.mxu1 %v1111_v47 }
 0x272   : > { %v1054_v52 = vadd.f32 %v1053_v48, %v4833_v20  ;;  %v1055_v54 = vpop.f32.mrb[27].mxu0  ;;  %1287 = vmatpush1.bf16.msra.mxu1 %v1110_v46  ;;  %v1092_v55 = vmax.f32 %v1050_v50, 0.0 }
 0x273   : > { %v1056_v12 = vadd.f32 %v1055_v54, %v4833_v20  ;;  %v1093_v56 = vmax.f32 %v1052_v10, 0.0 }
 0x274   : > { %v1094_v53 = vmax.f32 %v1054_v52, 0.0 }
 0x275   : > { %v1095_v59 = vmax.f32 %v1056_v12, 0.0  ;;  %v1171_v12 = vpop.permute.xlu0 %1170 }
 0x276   : > { %v1112_v60 = vpack.c.bf16 %v1094_v53, %v1092_v55 }
 0x277   : > { %v1113_v62 = vpack.c.bf16 %v1095_v59, %v1093_v56  ;;  %v1059_v1 = vpop.f32.mrb[28].mxu0 }
 0x278   : > { %v1060_v2 = vadd.f32 %v1059_v1, %v4838_v31  ;;  %v1061_v3 = vpop.f32.mrb[29].mxu0 }
 0x279   : > { %v1062_v17 = vadd.f32 %v1061_v3, %v4838_v31  ;;  %v1063_v8 = vpop.f32.mrb[30].mxu0  ;;  %1288 = vmatprep.subr.bf16.mxu1 %v1113_v62  ;;  %v3823_v31 = vld [vmem:[#allocation6 + $0x10] sm:$0xff]  }
 0x27a   : > { %v1064_v57 = vadd.f32 %v1063_v8, %v881_v7  ;;  %v1065_v11 = vpop.f32.mrb[31].mxu0  ;;  %1289 = vmatpush1.bf16.msra.mxu1 %v1112_v60  ;;  %v1096_v20 = vmax.f32 %v1060_v2, 0.0  ;;  %v1176_v60 = vpop.permute.xlu1 %1175 }
 0x27b   : > { %v1066_v13 = vadd.f32 %v1065_v11, %v881_v7  ;;  %v1097_v58 = vmax.f32 %v1062_v17, 0.0 }
 0x27c   : > { %v1098_v14 = vmax.f32 %v1064_v57, 0.0 }
 0x27d   : > { %v1099_v15 = vmax.f32 %v1066_v13, 0.0 }
 0x27e   : > { %v1114_v16 = vpack.c.bf16 %v1098_v14, %v1096_v20  ;;  %v1181_v20 = vpop.permute.xlu0 %1180 }
 0x27f   : > { %v1115_v18 = vpack.c.bf16 %v1099_v15, %v1097_v58 }
 0x281   : > { %1290 = vmatprep.subr.bf16.mxu1 %v1115_v18  ;;  %v1186_v18 = vpop.permute.xlu1 %1185 }
 0x282   : > { %1291 = vmatpush1.bf16.msra.mxu1 %v1114_v16 }
 0x285   : > { %1309 = vmatmul.mubr.bf16.vlgmr.msra.gmra.mrb[0].mxu1 %v3821_v19 }
 0x286   : > { %1318 = vmatprep.mubr.bf16.mxu1 %v4298_v0 }
 0x28d   : > { %1319 = vmatmul.mubr.bf16.gmra.mrb[4].mxu1 %v3822_v21 }
 0x28e   : > { %1328 = vmatprep.mubr.bf16.mxu1 %v4298_v0 }
 0x295   : > { %1329 = vmatmul.mubr.bf16.gmra.mrb[8].mxu1 %v3823_v31 }
 0x296   : > { %1338 = vmatprep.mubr.bf16.mxu1 %v4298_v0 }
 0x29d   : > { %1339 = vmatmul.mubr.bf16.gmra.mrb[12].mxu1 %v3824_v22 }
 0x29e   : > { %1348 = vmatprep.mubr.bf16.mxu1 %v4298_v0 }
 0x2a5   : > { %1349 = vmatmul.mubr.bf16.gmra.mrb[16].mxu1 %v3825_v23 }
 0x2a6   : > { %1358 = vmatprep.mubr.bf16.mxu1 %v4298_v0 }
 0x2ad   : > { %1359 = vmatmul.mubr.bf16.gmra.mrb[20].mxu1 %v3826_v24 }
 0x2ae   : > { %1368 = vmatprep.mubr.bf16.mxu1 %v4298_v0 }
 0x2b5   : > { %1369 = vmatmul.mubr.bf16.gmra.mrb[24].mxu1 %v3827_v25 }
 0x2b6   : > { %1378 = vmatprep.mubr.bf16.mxu1 %v4298_v0 }
 0x2bd   : > { %1379 = vmatmul.mubr.bf16.gmra.mrb[28].mxu1 %v3828_v61 }
 0x2be   : > { %1950 = vmatprep.mubr.bf16.mxu1 %v4298_v0 }
 0x358   : > { %v1310_v27 = vpop.f32.mrb[0].mxu1 }
 0x359   : > { %v1311_v28 = vadd.f32 %v1310_v27, %v1151_v26  ;;  %v1312_v63 = vpop.f32.mrb[1].mxu1 }
 0x35a   : > { %v1313_v30 = vadd.f32 %v1312_v63, %v1151_v26  ;;  %v1314_v32 = vpop.f32.mrb[2].mxu1 }
 0x35b   : > { %v1315_v33 = vadd.f32 %v1314_v32, %v1156_v29  ;;  %v1316_v34 = vpop.f32.mrb[3].mxu1  ;;  %v1389_v36 = vmax.f32 %v1311_v28, 0.0  ;;  %v1191_v28 = vpop.permute.xlu0 %1190 }
 0x35c   : > { %v1317_v35 = vadd.f32 %v1316_v34, %v1156_v29  ;;  %v1390_v38 = vmax.f32 %v1313_v30, 0.0 }
 0x35d   : > { %v1391_v37 = vmax.f32 %v1315_v33, 0.0  ;;  %v1196_v33 = vpop.permute.xlu1 %1195 }
 0x35e   : > { %v1392_v5 = vmax.f32 %v1317_v35, 0.0 }
 0x35f   : > { %v1421_v39 = vpack.c.bf16 %v1391_v37, %v1389_v36 }
 0x360   : > { %v1422_v41 = vpack.c.bf16 %v1392_v5, %v1390_v38  ;;  %v1320_v6 = vpop.f32.mrb[4].mxu1 }
 0x361   : > { %v1321_v42 = vadd.f32 %v1320_v6, %v1161_v40  ;;  %v1322_v43 = vpop.f32.mrb[5].mxu1 }
 0x362   : > { %v1323_v45 = vadd.f32 %v1322_v43, %v1161_v40  ;;  %v1324_v46 = vpop.f32.mrb[6].mxu1  ;;  %1597 = vmatprep.subr.bf16.mxu0 %v1422_v41 }
 0x363   : > { %v1325_v47 = vadd.f32 %v1324_v46, %v1166_v44  ;;  %v1326_v49 = vpop.f32.mrb[7].mxu1  ;;  %1598 = vmatpush1.bf16.msra.mxu0 %v1421_v39  ;;  %v1393_v51 = vmax.f32 %v1321_v42, 0.0  ;;  %v1201_v42 = vpop.permute.xlu0 %1200 }
 0x364   : > { %v1327_v50 = vadd.f32 %v1326_v49, %v1166_v44  ;;  %v1394_v48 = vmax.f32 %v1323_v45, 0.0 }
 0x365   : > { %v1395_v10 = vmax.f32 %v1325_v47, 0.0  ;;  %v1206_v47 = vpop.permute.xlu1 %1205 }
 0x366   : > { %v1396_v52 = vmax.f32 %v1327_v50, 0.0 }
 0x367   : > { %v1423_v54 = vpack.c.bf16 %v1395_v10, %v1393_v51 }
 0x368   : > { %v1424_v55 = vpack.c.bf16 %v1396_v52, %v1394_v48  ;;  %v1330_v53 = vpop.f32.mrb[8].mxu1 }
 0x369   : > { %v1331_v56 = vadd.f32 %v1330_v53, %v1171_v12  ;;  %v1332_v59 = vpop.f32.mrb[9].mxu1 }
 0x36a   : > { %v1333_v62 = vadd.f32 %v1332_v59, %v1171_v12  ;;  %v1334_v1 = vpop.f32.mrb[10].mxu1  ;;  %1599 = vmatprep.subr.bf16.mxu0 %v1424_v55 }
 0x36b   : > { %v1335_v2 = vadd.f32 %v1334_v1, %v1176_v60  ;;  %v1336_v3 = vpop.f32.mrb[11].mxu1  ;;  %1600 = vmatpush1.bf16.msra.mxu0 %v1423_v54  ;;  %v1397_v17 = vmax.f32 %v1331_v56, 0.0  ;;  %v1211_v56 = vpop.permute.xlu0 %1210 }
 0x36c   : > { %v1337_v7 = vadd.f32 %v1336_v3, %v1176_v60  ;;  %v1398_v57 = vmax.f32 %v1333_v62, 0.0 }
 0x36d   : > { %v1399_v8 = vmax.f32 %v1335_v2, 0.0  ;;  %v1216_v2 = vpop.permute.xlu1 %1215 }
 0x36e   : > { %v1400_v11 = vmax.f32 %v1337_v7, 0.0 }
 0x36f   : > { %v1425_v13 = vpack.c.bf16 %v1399_v8, %v1397_v17 }
 0x370   : > { %v1426_v14 = vpack.c.bf16 %v1400_v11, %v1398_v57  ;;  %v1340_v58 = vpop.f32.mrb[12].mxu1 }
 0x371   : > { %v1341_v15 = vadd.f32 %v1340_v58, %v1181_v20  ;;  %v1342_v16 = vpop.f32.mrb[13].mxu1 }
 0x372   : > { %v1343_v19 = vadd.f32 %v1342_v16, %v1181_v20  ;;  %v1344_v21 = vpop.f32.mrb[14].mxu1  ;;  %1601 = vmatprep.subr.bf16.mxu0 %v1426_v14 }
 0x373   : > { %v1345_v31 = vadd.f32 %v1344_v21, %v1186_v18  ;;  %v1346_v22 = vpop.f32.mrb[15].mxu1  ;;  %1602 = vmatpush1.bf16.msra.mxu0 %v1425_v13  ;;  %v1401_v24 = vmax.f32 %v1341_v15, 0.0  ;;  %v1221_v15 = vpop.permute.xlu0 %1220 }
 0x374   : > { %v1347_v23 = vadd.f32 %v1346_v22, %v1186_v18  ;;  %v1402_v61 = vmax.f32 %v1343_v19, 0.0 }
 0x375   : > { %v1403_v25 = vmax.f32 %v1345_v31, 0.0  ;;  %v1226_v31 = vpop.permute.xlu1 %1225 }
 0x376   : > { %v1404_v26 = vmax.f32 %v1347_v23, 0.0 }
 0x377   : > { %v1427_v27 = vpack.c.bf16 %v1403_v25, %v1401_v24 }
 0x378   : > { %v1428_v63 = vpack.c.bf16 %v1404_v26, %v1402_v61  ;;  %v1350_v29 = vpop.f32.mrb[16].mxu1 }
 0x379   : > { %v1351_v30 = vadd.f32 %v1350_v29, %v1191_v28  ;;  %v1352_v32 = vpop.f32.mrb[17].mxu1 }
 0x37a   : > { %v1353_v34 = vadd.f32 %v1352_v32, %v1191_v28  ;;  %v1354_v35 = vpop.f32.mrb[18].mxu1  ;;  %1603 = vmatprep.subr.bf16.mxu0 %v1428_v63  ;;  %v3829_v32 = vld [vmem:[#allocation9] sm:$0xff]  }
 0x37b   : > { %v1355_v36 = vadd.f32 %v1354_v35, %v1196_v33  ;;  %v1356_v37 = vpop.f32.mrb[19].mxu1  ;;  %1604 = vmatpush1.bf16.msra.mxu0 %v1427_v27  ;;  %v1405_v5 = vmax.f32 %v1351_v30, 0.0  ;;  %v3832_v35 = vld [vmem:[#allocation9 + $0x18] sm:$0xff]  }
 0x37c   : > { %v1357_v38 = vadd.f32 %v1356_v37, %v1196_v33  ;;  %v1406_v40 = vmax.f32 %v1353_v34, 0.0  ;;  %v3830_v33 = vld [vmem:[#allocation9 + $0x8] sm:$0xff]   ;;  %v3831_v34 = vld [vmem:[#allocation9 + $0x10] sm:$0xff]  }
 0x37d   : > { %v1407_v39 = vmax.f32 %v1355_v36, 0.0  ;;  %v3833_v36 = vld [vmem:[#allocation9 + $0x20] sm:$0xff]   ;;  %v3834_v37 = vld [vmem:[#allocation9 + $0x28] sm:$0xff]  }
 0x37e   : > { %v1408_v41 = vmax.f32 %v1357_v38, 0.0  ;;  %v3835_v38 = vld [vmem:[#allocation9 + $0x30] sm:$0xff]  }
 0x37f   : > { %v1429_v6 = vpack.c.bf16 %v1407_v39, %v1405_v5  ;;  %v3836_v5 = vld [vmem:[#allocation9 + $0x38] sm:$0xff]   ;;  %v1472_v39 = vpop.permute.xlu0 %1471 }
 0x380   : > { %v1430_v43 = vpack.c.bf16 %v1408_v41, %v1406_v40  ;;  %v1360_v44 = vpop.f32.mrb[20].mxu1 }
 0x381   : > { %v1361_v45 = vadd.f32 %v1360_v44, %v1201_v42  ;;  %v1362_v46 = vpop.f32.mrb[21].mxu1 }
 0x382   : > { %v1363_v49 = vadd.f32 %v1362_v46, %v1201_v42  ;;  %v1364_v50 = vpop.f32.mrb[22].mxu1  ;;  %1605 = vmatprep.subr.bf16.mxu0 %v1430_v43  ;;  %v1477_v42 = vpop.permute.xlu1 %1476 }
 0x383   : > { %v1365_v51 = vadd.f32 %v1364_v50, %v1206_v47  ;;  %v1366_v10 = vpop.f32.mrb[23].mxu1  ;;  %1606 = vmatpush1.bf16.msra.mxu0 %v1429_v6  ;;  %v1409_v52 = vmax.f32 %v1361_v45, 0.0 }
 0x384   : > { %v1367_v48 = vadd.f32 %v1366_v10, %v1206_v47  ;;  %v1410_v12 = vmax.f32 %v1363_v49, 0.0 }
 0x385   : > { %v1411_v54 = vmax.f32 %v1365_v51, 0.0 }
 0x386   : > { %v1412_v55 = vmax.f32 %v1367_v48, 0.0 }
 0x387   : > { %v1431_v53 = vpack.c.bf16 %v1411_v54, %v1409_v52  ;;  %v1482_v52 = vpop.permute.xlu0 %1481 }
 0x388   : > { %v1432_v59 = vpack.c.bf16 %v1412_v55, %v1410_v12  ;;  %v1370_v60 = vpop.f32.mrb[24].mxu1 }
 0x389   : > { %v1371_v62 = vadd.f32 %v1370_v60, %v1211_v56  ;;  %v1372_v1 = vpop.f32.mrb[25].mxu1 }
 0x38a   : > { %v1373_v3 = vadd.f32 %v1372_v1, %v1211_v56  ;;  %v1374_v7 = vpop.f32.mrb[26].mxu1  ;;  %1607 = vmatprep.subr.bf16.mxu0 %v1432_v59  ;;  %v1487_v56 = vpop.permute.xlu1 %1486 }
 0x38b   : > { %v1375_v17 = vadd.f32 %v1374_v7, %v1216_v2  ;;  %v1376_v8 = vpop.f32.mrb[27].mxu1  ;;  %1608 = vmatpush1.bf16.msra.mxu0 %v1431_v53  ;;  %v1413_v11 = vmax.f32 %v1371_v62, 0.0 }
 0x38c   : > { %v1377_v57 = vadd.f32 %v1376_v8, %v1216_v2  ;;  %v1414_v20 = vmax.f32 %v1373_v3, 0.0 }
 0x38d   : > { %v1415_v13 = vmax.f32 %v1375_v17, 0.0 }
 0x38e   : > { %v1416_v14 = vmax.f32 %v1377_v57, 0.0 }
 0x38f   : > { %v1433_v58 = vpack.c.bf16 %v1415_v13, %v1413_v11  ;;  %v1492_v11 = vpop.permute.xlu0 %1491 }
 0x390   : > { %v1434_v16 = vpack.c.bf16 %v1416_v14, %v1414_v20  ;;  %v1380_v18 = vpop.f32.mrb[28].mxu1 }
 0x391   : > { %v1381_v19 = vadd.f32 %v1380_v18, %v1221_v15  ;;  %v1382_v21 = vpop.f32.mrb[29].mxu1 }
 0x392   : > { %v1383_v22 = vadd.f32 %v1382_v21, %v1221_v15  ;;  %v1384_v23 = vpop.f32.mrb[30].mxu1  ;;  %1609 = vmatprep.subr.bf16.mxu0 %v1434_v16  ;;  %v1497_v15 = vpop.permute.xlu1 %1496 }
 0x393   : > { %v1385_v24 = vadd.f32 %v1384_v23, %v1226_v31  ;;  %v1386_v25 = vpop.f32.mrb[31].mxu1  ;;  %1610 = vmatpush1.bf16.msra.mxu0 %v1433_v58  ;;  %v1417_v26 = vmax.f32 %v1381_v19, 0.0 }
 0x394   : > { %v1387_v61 = vadd.f32 %v1386_v25, %v1226_v31  ;;  %v1418_v28 = vmax.f32 %v1383_v22, 0.0 }
 0x395   : > { %v1419_v27 = vmax.f32 %v1385_v24, 0.0 }
 0x396   : > { %v1420_v63 = vmax.f32 %v1387_v61, 0.0 }
 0x397   : > { %v1435_v29 = vpack.c.bf16 %v1419_v27, %v1417_v26  ;;  %v1502_v26 = vpop.permute.xlu0 %1501 }
 0x398   : > { %v1436_v30 = vpack.c.bf16 %v1420_v63, %v1418_v28 }
 0x39a   : > { %1611 = vmatprep.subr.bf16.mxu0 %v1436_v30  ;;  %v1507_v30 = vpop.permute.xlu1 %1506 }
 0x39b   : > { %1612 = vmatpush1.bf16.msra.mxu0 %v1435_v29 }
 0x39e   : > { %1630 = vmatmul.mubr.bf16.vlgmr.msra.gmra.mrb[32].mxu0 %v3829_v32 }
 0x39f   : > { %1639 = vmatprep.mubr.bf16.mxu0 %v4298_v0 }
 0x3a6   : > { %1640 = vmatmul.mubr.bf16.gmra.mrb[36].mxu0 %v3830_v33 }
 0x3a7   : > { %1649 = vmatprep.mubr.bf16.mxu0 %v4298_v0 }
 0x3ae   : > { %1650 = vmatmul.mubr.bf16.gmra.mrb[40].mxu0 %v3831_v34 }
 0x3af   : > { %1659 = vmatprep.mubr.bf16.mxu0 %v4298_v0 }
 0x3b6   : > { %1660 = vmatmul.mubr.bf16.gmra.mrb[44].mxu0 %v3832_v35 }
 0x3b7   : > { %1669 = vmatprep.mubr.bf16.mxu0 %v4298_v0 }
 0x3be   : > { %1670 = vmatmul.mubr.bf16.gmra.mrb[48].mxu0 %v3833_v36 }
 0x3bf   : > { %1679 = vmatprep.mubr.bf16.mxu0 %v4298_v0 }
 0x3c6   : > { %1680 = vmatmul.mubr.bf16.gmra.mrb[52].mxu0 %v3834_v37 }
 0x3c7   : > { %1689 = vmatprep.mubr.bf16.mxu0 %v4298_v0 }
 0x3ce   : > { %1690 = vmatmul.mubr.bf16.gmra.mrb[56].mxu0 %v3835_v38 }
 0x3cf   : > { %1699 = vmatprep.mubr.bf16.mxu0 %v4298_v0 }
 0x3d6   : > { %1700 = vmatmul.mubr.bf16.gmra.mrb[60].mxu0 %v3836_v5 }
 0x3d7   : > { %2271 = vmatprep.mubr.bf16.mxu0 %v4298_v0 }
 0x471   : > { %v1631_v40 = vpop.f32.mrb[32].mxu0 }
 0x472   : > { %v1632_v41 = vadd.f32 %v1631_v40, %v1472_v39  ;;  %v1633_v6 = vpop.f32.mrb[33].mxu0 }
 0x473   : > { %v1634_v43 = vadd.f32 %v1633_v6, %v1472_v39  ;;  %v1635_v44 = vpop.f32.mrb[34].mxu0 }
 0x474   : > { %v1636_v45 = vadd.f32 %v1635_v44, %v1477_v42  ;;  %v1637_v46 = vpop.f32.mrb[35].mxu0  ;;  %v1710_v49 = vmax.f32 %v1632_v41, 0.0  ;;  %v1512_v41 = vpop.permute.xlu0 %1511 }
 0x475   : > { %v1638_v47 = vadd.f32 %v1637_v46, %v1477_v42  ;;  %v1711_v51 = vmax.f32 %v1634_v43, 0.0 }
 0x476   : > { %v1712_v50 = vmax.f32 %v1636_v45, 0.0  ;;  %v1517_v45 = vpop.permute.xlu1 %1516 }
 0x477   : > { %v1713_v10 = vmax.f32 %v1638_v47, 0.0 }
 0x478   : > { %v1742_v48 = vpack.c.bf16 %v1712_v50, %v1710_v49 }
 0x479   : > { %v1743_v54 = vpack.c.bf16 %v1713_v10, %v1711_v51  ;;  %v1641_v12 = vpop.f32.mrb[36].mxu0 }
 0x47a   : > { %v1642_v55 = vadd.f32 %v1641_v12, %v1482_v52  ;;  %v1643_v53 = vpop.f32.mrb[37].mxu0 }
 0x47b   : > { %v1644_v59 = vadd.f32 %v1643_v53, %v1482_v52  ;;  %v1645_v60 = vpop.f32.mrb[38].mxu0  ;;  %1918 = vmatprep.subr.bf16.mxu1 %v1743_v54 }
 0x47c   : > { %v1646_v62 = vadd.f32 %v1645_v60, %v1487_v56  ;;  %v1647_v1 = vpop.f32.mrb[39].mxu0  ;;  %1919 = vmatpush1.bf16.msra.mxu1 %v1742_v48  ;;  %v1714_v3 = vmax.f32 %v1642_v55, 0.0  ;;  %v1522_v55 = vpop.permute.xlu0 %1521 }
 0x47d   : > { %v1648_v2 = vadd.f32 %v1647_v1, %v1487_v56  ;;  %v1715_v17 = vmax.f32 %v1644_v59, 0.0 }
 0x47e   : > { %v1716_v7 = vmax.f32 %v1646_v62, 0.0  ;;  %v1527_v62 = vpop.permute.xlu1 %1526 }
 0x47f   : > { %v1717_v8 = vmax.f32 %v1648_v2, 0.0 }
 0x480   : > { %v1744_v57 = vpack.c.bf16 %v1716_v7, %v1714_v3 }
 0x481   : > { %v1745_v13 = vpack.c.bf16 %v1717_v8, %v1715_v17  ;;  %v1651_v20 = vpop.f32.mrb[40].mxu0 }
 0x482   : > { %v1652_v14 = vadd.f32 %v1651_v20, %v1492_v11  ;;  %v1653_v58 = vpop.f32.mrb[41].mxu0 }
 0x483   : > { %v1654_v16 = vadd.f32 %v1653_v58, %v1492_v11  ;;  %v1655_v18 = vpop.f32.mrb[42].mxu0  ;;  %1920 = vmatprep.subr.bf16.mxu1 %v1745_v13 }
 0x484   : > { %v1656_v19 = vadd.f32 %v1655_v18, %v1497_v15  ;;  %v1657_v21 = vpop.f32.mrb[43].mxu0  ;;  %1921 = vmatpush1.bf16.msra.mxu1 %v1744_v57  ;;  %v1718_v22 = vmax.f32 %v1652_v14, 0.0  ;;  %v1532_v14 = vpop.permute.xlu0 %1531 }
 0x485   : > { %v1658_v31 = vadd.f32 %v1657_v21, %v1497_v15  ;;  %v1719_v24 = vmax.f32 %v1654_v16, 0.0 }
 0x486   : > { %v1720_v23 = vmax.f32 %v1656_v19, 0.0  ;;  %v1537_v19 = vpop.permute.xlu1 %1536 }
 0x487   : > { %v1721_v25 = vmax.f32 %v1658_v31, 0.0 }
 0x488   : > { %v1746_v61 = vpack.c.bf16 %v1720_v23, %v1718_v22 }
 0x489   : > { %v1747_v27 = vpack.c.bf16 %v1721_v25, %v1719_v24  ;;  %v1661_v28 = vpop.f32.mrb[44].mxu0 }
 0x48a   : > { %v1662_v63 = vadd.f32 %v1661_v28, %v1502_v26  ;;  %v1663_v29 = vpop.f32.mrb[45].mxu0 }
 0x48b   : > { %v1664_v32 = vadd.f32 %v1663_v29, %v1502_v26  ;;  %v1665_v33 = vpop.f32.mrb[46].mxu0  ;;  %1922 = vmatprep.subr.bf16.mxu1 %v1747_v27 }
 0x48c   : > { %v1666_v34 = vadd.f32 %v1665_v33, %v1507_v30  ;;  %v1667_v35 = vpop.f32.mrb[47].mxu0  ;;  %1923 = vmatpush1.bf16.msra.mxu1 %v1746_v61  ;;  %v1722_v37 = vmax.f32 %v1662_v63, 0.0  ;;  %v1542_v63 = vpop.permute.xlu0 %1541 }
 0x48d   : > { %v1668_v36 = vadd.f32 %v1667_v35, %v1507_v30  ;;  %v1723_v5 = vmax.f32 %v1664_v32, 0.0 }
 0x48e   : > { %v1724_v38 = vmax.f32 %v1666_v34, 0.0  ;;  %v1547_v34 = vpop.permute.xlu1 %1546 }
 0x48f   : > { %v1725_v39 = vmax.f32 %v1668_v36, 0.0 }
 0x490   : > { %v1748_v40 = vpack.c.bf16 %v1724_v38, %v1722_v37 }
 0x491   : > { %v1749_v6 = vpack.c.bf16 %v1725_v39, %v1723_v5  ;;  %v1671_v42 = vpop.f32.mrb[48].mxu0 }
 0x492   : > { %v1672_v43 = vadd.f32 %v1671_v42, %v1512_v41  ;;  %v1673_v44 = vpop.f32.mrb[49].mxu0 }
 0x493   : > { %v1674_v46 = vadd.f32 %v1673_v44, %v1512_v41  ;;  %v1675_v47 = vpop.f32.mrb[50].mxu0  ;;  %1924 = vmatprep.subr.bf16.mxu1 %v1749_v6  ;;  %v3837_v44 = vld [vmem:[#allocation12] sm:$0xff]  }
 0x494   : > { %v1676_v49 = vadd.f32 %v1675_v47, %v1517_v45  ;;  %v1677_v50 = vpop.f32.mrb[51].mxu0  ;;  %1925 = vmatpush1.bf16.msra.mxu1 %v1748_v40  ;;  %v1726_v10 = vmax.f32 %v1672_v43, 0.0  ;;  %v3840_v47 = vld [vmem:[#allocation12 + $0x18] sm:$0xff]  }
 0x495   : > { %v1678_v51 = vadd.f32 %v1677_v50, %v1517_v45  ;;  %v1727_v52 = vmax.f32 %v1674_v46, 0.0  ;;  %v3838_v45 = vld [vmem:[#allocation12 + $0x8] sm:$0xff]   ;;  %v3839_v46 = vld [vmem:[#allocation12 + $0x10] sm:$0xff]   ;;  %v3844_v50 = vld [vmem:[#allocation12 + $0x38] sm:$0xff]  }
 0x496   : > { %v1728_v48 = vmax.f32 %v1676_v49, 0.0  ;;  %v3841_v49 = vld [vmem:[#allocation12 + $0x20] sm:$0xff]  }
 0x497   : > { %v1729_v54 = vmax.f32 %v1678_v51, 0.0  ;;  %v1793_v51 = vpop.permute.xlu0 %1792 }
 0x498   : > { %v1750_v12 = vpack.c.bf16 %v1728_v48, %v1726_v10 }
 0x499   : > { %v1751_v53 = vpack.c.bf16 %v1729_v54, %v1727_v52  ;;  %v1681_v56 = vpop.f32.mrb[52].mxu0  ;;  %v1798_v54 = vpop.permute.xlu1 %1797 }
 0x49a   : > { %v1682_v59 = vadd.f32 %v1681_v56, %v1522_v55  ;;  %v1683_v60 = vpop.f32.mrb[53].mxu0 }
 0x49b   : > { %v1684_v1 = vadd.f32 %v1683_v60, %v1522_v55  ;;  %v1685_v2 = vpop.f32.mrb[54].mxu0  ;;  %1926 = vmatprep.subr.bf16.mxu1 %v1751_v53 }
 0x49c   : > { %v1686_v3 = vadd.f32 %v1685_v2, %v1527_v62  ;;  %v1687_v7 = vpop.f32.mrb[55].mxu0  ;;  %1927 = vmatpush1.bf16.msra.mxu1 %v1750_v12  ;;  %v1730_v8 = vmax.f32 %v1682_v59, 0.0 }
 0x49d   : > { %v1688_v17 = vadd.f32 %v1687_v7, %v1527_v62  ;;  %v1731_v11 = vmax.f32 %v1684_v1, 0.0  ;;  %v1803_v7 = vpop.permute.xlu0 %1802 }
 0x49e   : > { %v1732_v57 = vmax.f32 %v1686_v3, 0.0 }
 0x49f   : > { %v1733_v13 = vmax.f32 %v1688_v17, 0.0 }
 0x4a0   : > { %v1752_v20 = vpack.c.bf16 %v1732_v57, %v1730_v8 }
 0x4a1   : > { %v1753_v58 = vpack.c.bf16 %v1733_v13, %v1731_v11  ;;  %v1691_v15 = vpop.f32.mrb[56].mxu0  ;;  %v1808_v13 = vpop.permute.xlu1 %1807 }
 0x4a2   : > { %v1692_v16 = vadd.f32 %v1691_v15, %v1532_v14  ;;  %v1693_v18 = vpop.f32.mrb[57].mxu0 }
 0x4a3   : > { %v1694_v21 = vadd.f32 %v1693_v18, %v1532_v14  ;;  %v1695_v31 = vpop.f32.mrb[58].mxu0  ;;  %1928 = vmatprep.subr.bf16.mxu1 %v1753_v58 }
 0x4a4   : > { %v1696_v22 = vadd.f32 %v1695_v31, %v1537_v19  ;;  %v1697_v23 = vpop.f32.mrb[59].mxu0  ;;  %1929 = vmatpush1.bf16.msra.mxu1 %v1752_v20  ;;  %v1734_v25 = vmax.f32 %v1692_v16, 0.0 }
 0x4a5   : > { %v1698_v24 = vadd.f32 %v1697_v23, %v1537_v19  ;;  %v1735_v26 = vmax.f32 %v1694_v21, 0.0  ;;  %v1813_v23 = vpop.permute.xlu0 %1812 }
 0x4a6   : > { %v1736_v61 = vmax.f32 %v1696_v22, 0.0 }
 0x4a7   : > { %v1737_v27 = vmax.f32 %v1698_v24, 0.0 }
 0x4a8   : > { %v1754_v28 = vpack.c.bf16 %v1736_v61, %v1734_v25 }
 0x4a9   : > { %v1755_v29 = vpack.c.bf16 %v1737_v27, %v1735_v26  ;;  %v1701_v30 = vpop.f32.mrb[60].mxu0  ;;  %v1818_v27 = vpop.permute.xlu1 %1817 }
 0x4aa   : > { %v1702_v32 = vadd.f32 %v1701_v30, %v1542_v63  ;;  %v1703_v33 = vpop.f32.mrb[61].mxu0 }
 0x4ab   : > { %v1704_v35 = vadd.f32 %v1703_v33, %v1542_v63  ;;  %v1705_v36 = vpop.f32.mrb[62].mxu0  ;;  %1930 = vmatprep.subr.bf16.mxu1 %v1755_v29 }
 0x4ac   : > { %v1706_v37 = vadd.f32 %v1705_v36, %v1547_v34  ;;  %v1707_v38 = vpop.f32.mrb[63].mxu0  ;;  %1931 = vmatpush1.bf16.msra.mxu1 %v1754_v28  ;;  %v1738_v39 = vmax.f32 %v1702_v32, 0.0 }
 0x4ad   : > { %v1708_v5 = vadd.f32 %v1707_v38, %v1547_v34  ;;  %v1739_v41 = vmax.f32 %v1704_v35, 0.0  ;;  %v1823_v38 = vpop.permute.xlu0 %1822 }
 0x4ae   : > { %v1740_v40 = vmax.f32 %v1706_v37, 0.0 }
 0x4af   : > { %v1741_v6 = vmax.f32 %v1708_v5, 0.0 }
 0x4b0   : > { %v1756_v42 = vpack.c.bf16 %v1740_v40, %v1738_v39 }
 0x4b1   : > { %v1757_v43 = vpack.c.bf16 %v1741_v6, %v1739_v41  ;;  %v1828_v6 = vpop.permute.xlu1 %1827 }
 0x4b3   : > { %1932 = vmatprep.subr.bf16.mxu1 %v1757_v43 }
 0x4b4   : > { %1933 = vmatpush1.bf16.msra.mxu1 %v1756_v42 }
 0x4b5   : > { %3607 = vmatprep.subr.msk.bf16.mxu1 %vm948_vm0, %v4787_v4  ;;  %v3842_v4 = vld [vmem:[#allocation12 + $0x28] sm:$0xff]  }
 0x4b7   : > { %1951 = vmatmul.mubr.bf16.vlgmr.msra.gmra.mrb[32].mxu1 %v3837_v44 }
 0x4b8   : > { %1960 = vmatprep.mubr.bf16.mxu1 %v4298_v0  ;;  %2497 = vmatpush1.bf16.msra.mxu1 %v4792_v9  ;;  %v3843_v9 = vld [vmem:[#allocation12 + $0x30] sm:$0xff]  }
 0x4bf   : > { %1961 = vmatmul.mubr.bf16.gmra.mrb[36].mxu1 %v3838_v45 }
 0x4c0   : > { %1970 = vmatprep.mubr.bf16.mxu1 %v4298_v0 }
 0x4c7   : > { %1971 = vmatmul.mubr.bf16.gmra.mrb[40].mxu1 %v3839_v46 }
 0x4c8   : > { %1980 = vmatprep.mubr.bf16.mxu1 %v4298_v0 }
 0x4cf   : > { %1981 = vmatmul.mubr.bf16.gmra.mrb[44].mxu1 %v3840_v47 }
 0x4d0   : > { %1990 = vmatprep.mubr.bf16.mxu1 %v4298_v0 }
 0x4d7   : > { %1991 = vmatmul.mubr.bf16.gmra.mrb[48].mxu1 %v3841_v49 }
 0x4d8   : > { %2000 = vmatprep.mubr.bf16.mxu1 %v4298_v0 }
 0x4df   : > { %2001 = vmatmul.mubr.bf16.gmra.mrb[52].mxu1 %v3842_v4 }
 0x4e0   : > { %2010 = vmatprep.mubr.bf16.mxu1 %v4298_v0 }
 0x4e7   : > { %2011 = vmatmul.mubr.bf16.gmra.mrb[56].mxu1 %v3843_v9 }
 0x4e8   : > { %2020 = vmatprep.mubr.bf16.mxu1 %v4298_v0 }
 0x4ef   : > { %2021 = vmatmul.mubr.bf16.gmra.mrb[60].mxu1 %v3844_v50 }
 0x4f0   : > { %2528 = vmatprep.mubr.bf16.mxu1 %v4298_v0 }
 0x58a   : > { %v1952_v10 = vpop.f32.mrb[32].mxu1 }
 0x58b   : > { %v1953_v48 = vadd.f32 %v1952_v10, %v1793_v51  ;;  %v1954_v52 = vpop.f32.mrb[33].mxu1 }
 0x58c   : > { %v1955_v12 = vadd.f32 %v1954_v52, %v1793_v51  ;;  %v1956_v55 = vpop.f32.mrb[34].mxu1  ;;  %v1833_v51 = vpop.permute.xlu0 %1832 }
 0x58d   : > { %v1957_v53 = vadd.f32 %v1956_v55, %v1798_v54  ;;  %v1958_v56 = vpop.f32.mrb[35].mxu1  ;;  %v2031_v60 = vmax.f32 %v1953_v48, 0.0 }
 0x58e   : > { %v1959_v59 = vadd.f32 %v1958_v56, %v1798_v54  ;;  %v2032_v1 = vmax.f32 %v1955_v12, 0.0  ;;  %v1838_v12 = vpop.permute.xlu1 %1837 }
 0x58f   : > { %v2033_v62 = vmax.f32 %v1957_v53, 0.0 }
 0x590   : > { %v2034_v2 = vmax.f32 %v1959_v59, 0.0 }
 0x591   : > { %v2063_v3 = vpack.c.bf16 %v2033_v62, %v2031_v60 }
 0x592   : > { %v2064_v17 = vpack.c.bf16 %v2034_v2, %v2032_v1  ;;  %v1962_v8 = vpop.f32.mrb[36].mxu1 }
 0x593   : > { %v1963_v57 = vadd.f32 %v1962_v8, %v1803_v7  ;;  %v1964_v11 = vpop.f32.mrb[37].mxu1 }
 0x594   : > { %v1965_v20 = vadd.f32 %v1964_v11, %v1803_v7  ;;  %v1966_v14 = vpop.f32.mrb[38].mxu1  ;;  %2239 = vmatprep.subr.bf16.mxu0 %v2064_v17  ;;  %v1843_v17 = vpop.permute.xlu0 %1842 }
 0x595   : > { %v1967_v58 = vadd.f32 %v1966_v14, %v1808_v13  ;;  %v1968_v15 = vpop.f32.mrb[39].mxu1  ;;  %2240 = vmatpush1.bf16.msra.mxu0 %v2063_v3  ;;  %v2035_v18 = vmax.f32 %v1963_v57, 0.0 }
 0x596   : > { %v1969_v16 = vadd.f32 %v1968_v15, %v1808_v13  ;;  %v2036_v21 = vmax.f32 %v1965_v20, 0.0  ;;  %v1848_v20 = vpop.permute.xlu1 %1847 }
 0x597   : > { %v2037_v19 = vmax.f32 %v1967_v58, 0.0 }
 0x598   : > { %v2038_v31 = vmax.f32 %v1969_v16, 0.0 }
 0x599   : > { %v2065_v22 = vpack.c.bf16 %v2037_v19, %v2035_v18 }
 0x59a   : > { %v2066_v24 = vpack.c.bf16 %v2038_v31, %v2036_v21  ;;  %v1972_v25 = vpop.f32.mrb[40].mxu1 }
 0x59b   : > { %v1973_v61 = vadd.f32 %v1972_v25, %v1813_v23  ;;  %v1974_v26 = vpop.f32.mrb[41].mxu1 }
 0x59c   : > { %v1975_v28 = vadd.f32 %v1974_v26, %v1813_v23  ;;  %v1976_v63 = vpop.f32.mrb[42].mxu1  ;;  %2241 = vmatprep.subr.bf16.mxu0 %v2066_v24  ;;  %v1853_v24 = vpop.permute.xlu0 %1852 }
 0x59d   : > { %v1977_v29 = vadd.f32 %v1976_v63, %v1818_v27  ;;  %v1978_v30 = vpop.f32.mrb[43].mxu1  ;;  %2242 = vmatpush1.bf16.msra.mxu0 %v2065_v22  ;;  %v2039_v33 = vmax.f32 %v1973_v61, 0.0 }
 0x59e   : > { %v1979_v32 = vadd.f32 %v1978_v30, %v1818_v27  ;;  %v2040_v35 = vmax.f32 %v1975_v28, 0.0  ;;  %v1858_v28 = vpop.permute.xlu1 %1857 }
 0x59f   : > { %v2041_v34 = vmax.f32 %v1977_v29, 0.0 }
 0x5a0   : > { %v2042_v36 = vmax.f32 %v1979_v32, 0.0 }
 0x5a1   : > { %v2067_v37 = vpack.c.bf16 %v2041_v34, %v2039_v33 }
 0x5a2   : > { %v2068_v5 = vpack.c.bf16 %v2042_v36, %v2040_v35  ;;  %v1982_v39 = vpop.f32.mrb[44].mxu1 }
 0x5a3   : > { %v1983_v40 = vadd.f32 %v1982_v39, %v1823_v38  ;;  %v1984_v41 = vpop.f32.mrb[45].mxu1 }
 0x5a4   : > { %v1985_v42 = vadd.f32 %v1984_v41, %v1823_v38  ;;  %v1986_v43 = vpop.f32.mrb[46].mxu1  ;;  %2243 = vmatprep.subr.bf16.mxu0 %v2068_v5  ;;  %v1863_v5 = vpop.permute.xlu0 %1862 }
 0x5a5   : > { %v1987_v44 = vadd.f32 %v1986_v43, %v1828_v6  ;;  %v1988_v45 = vpop.f32.mrb[47].mxu1  ;;  %2244 = vmatpush1.bf16.msra.mxu0 %v2067_v37  ;;  %v2043_v47 = vmax.f32 %v1983_v40, 0.0 }
 0x5a6   : > { %v1989_v46 = vadd.f32 %v1988_v45, %v1828_v6  ;;  %v2044_v4 = vmax.f32 %v1985_v42, 0.0  ;;  %v1868_v42 = vpop.permute.xlu1 %1867 }
 0x5a7   : > { %v2045_v49 = vmax.f32 %v1987_v44, 0.0 }
 0x5a8   : > { %v2046_v9 = vmax.f32 %v1989_v46, 0.0 }
 0x5a9   : > { %v2069_v50 = vpack.c.bf16 %v2045_v49, %v2043_v47 }
 0x5aa   : > { %v2070_v10 = vpack.c.bf16 %v2046_v9, %v2044_v4  ;;  %v1992_v48 = vpop.f32.mrb[48].mxu1 }
 0x5ab   : > { %v1993_v52 = vadd.f32 %v1992_v48, %v1833_v51  ;;  %v1994_v54 = vpop.f32.mrb[49].mxu1  ;;  %v3845_v48 = vld [vmem:[#allocation15] sm:$0xff]  }
 0x5ac   : > { %v1995_v55 = vadd.f32 %v1994_v54, %v1833_v51  ;;  %v1996_v53 = vpop.f32.mrb[50].mxu1  ;;  %2245 = vmatprep.subr.bf16.mxu0 %v2070_v10  ;;  %v3847_v54 = vld [vmem:[#allocation15 + $0x10] sm:$0xff]  }
 0x5ad   : > { %v1997_v56 = vadd.f32 %v1996_v53, %v1838_v12  ;;  %v1998_v59 = vpop.f32.mrb[51].mxu1  ;;  %2246 = vmatpush1.bf16.msra.mxu0 %v2069_v50  ;;  %v2047_v62 = vmax.f32 %v1993_v52, 0.0  ;;  %v3846_v52 = vld [vmem:[#allocation15 + $0x8] sm:$0xff]  }
 0x5ae   : > { %v1999_v60 = vadd.f32 %v1998_v59, %v1838_v12  ;;  %v2048_v2 = vmax.f32 %v1995_v55, 0.0  ;;  %v3848_v12 = vld [vmem:[#allocation15 + $0x18] sm:$0xff]   ;;  %v3849_v55 = vld [vmem:[#allocation15 + $0x20] sm:$0xff]   ;;  %v3850_v53 = vld [vmem:[#allocation15 + $0x28] sm:$0xff]  }
 0x5af   : > { %v2049_v1 = vmax.f32 %v1997_v56, 0.0  ;;  %v3851_v56 = vld [vmem:[#allocation15 + $0x30] sm:$0xff]   ;;  %v3852_v59 = vld [vmem:[#allocation15 + $0x38] sm:$0xff]  }
 0x5b0   : > { %v2050_v3 = vmax.f32 %v1999_v60, 0.0  ;;  %v3853_v60 = vld [vmem:[%s5043_s12] sm:$0xff]  }
 0x5b1   : > { %v2071_v7 = vpack.c.bf16 %v2049_v1, %v2047_v62  ;;  %3608 = vmatmul.mubr.msk.bf16.vlgmr.msra.gmra.mrb[64].mxu1 %vm923_vm1, %v3853_v60  ;;  %v3854_v62 = vld [vmem:[%s5043_s12 + $0x8] sm:$0xff]   ;;  %v3855_v1 = vld [vmem:[%s5043_s12 + $0x10] sm:$0xff]  }
 0x5b2   : > { %v2072_v8 = vpack.c.bf16 %v2050_v3, %v2048_v2  ;;  %v2002_v57 = vpop.f32.mrb[52].mxu1  ;;  %2538 = vmatprep.mubr.bf16.mxu1 %v4298_v0  ;;  %v3856_v2 = vld [vmem:[%s5043_s12 + $0x18] sm:$0xff]   ;;  %v3857_v3 = vld [vmem:[%s5043_s12 + $0x20] sm:$0xff]  }
 0x5b3   : > { %v2003_v11 = vadd.f32 %v2002_v57, %v1843_v17  ;;  %v2004_v13 = vpop.f32.mrb[53].mxu1  ;;  %v2114_v57 = vpop.permute.xlu0 %2113 }
 0x5b4   : > { %v2005_v14 = vadd.f32 %v2004_v13, %v1843_v17  ;;  %v2006_v58 = vpop.f32.mrb[54].mxu1  ;;  %2247 = vmatprep.subr.bf16.mxu0 %v2072_v8  ;;  %v3859_v17 = vld [vmem:[%s5043_s12 + $0x30] sm:$0xff]   ;;  %v3860_v8 = vld [vmem:[%s5043_s12 + $0x38] sm:$0xff]  }
 0x5b5   : > { %v2007_v15 = vadd.f32 %v2006_v58, %v1848_v20  ;;  %v2008_v16 = vpop.f32.mrb[55].mxu1  ;;  %2248 = vmatpush1.bf16.msra.mxu0 %v2071_v7  ;;  %v2051_v19 = vmax.f32 %v2003_v11, 0.0  ;;  %v3858_v7 = vld [vmem:[%s5043_s12 + $0x28] sm:$0xff]  }
 0x5b6   : > { %v2009_v18 = vadd.f32 %v2008_v16, %v1848_v20  ;;  %v2052_v31 = vmax.f32 %v2005_v14, 0.0  ;;  %v2119_v14 = vpop.permute.xlu1 %2118 }
 0x5b7   : > { %v2053_v21 = vmax.f32 %v2007_v15, 0.0 }
 0x5b8   : > { %v2054_v22 = vmax.f32 %v2009_v18, 0.0 }
 0x5b9   : > { %v2073_v23 = vpack.c.bf16 %v2053_v21, %v2051_v19  ;;  %3609 = vmatmul.mubr.msk.bf16.gmra.mrb[68].mxu1 %vm923_vm1, %v3854_v62 }
 0x5ba   : > { %v2074_v25 = vpack.c.bf16 %v2054_v22, %v2052_v31  ;;  %v2012_v61 = vpop.f32.mrb[56].mxu1  ;;  %2548 = vmatprep.mubr.bf16.mxu1 %v4298_v0 }
 0x5bb   : > { %v2013_v26 = vadd.f32 %v2012_v61, %v1853_v24  ;;  %v2014_v27 = vpop.f32.mrb[57].mxu1 }
 0x5bc   : > { %v2015_v63 = vadd.f32 %v2014_v27, %v1853_v24  ;;  %v2016_v29 = vpop.f32.mrb[58].mxu1  ;;  %2249 = vmatprep.subr.bf16.mxu0 %v2074_v25  ;;  %v2124_v25 = vpop.permute.xlu0 %2123 }
 0x5bd   : > { %v2017_v30 = vadd.f32 %v2016_v29, %v1858_v28  ;;  %v2018_v32 = vpop.f32.mrb[59].mxu1  ;;  %2250 = vmatpush1.bf16.msra.mxu0 %v2073_v23  ;;  %v2055_v34 = vmax.f32 %v2013_v26, 0.0 }
 0x5be   : > { %v2019_v33 = vadd.f32 %v2018_v32, %v1858_v28  ;;  %v2056_v36 = vmax.f32 %v2015_v63, 0.0  ;;  %v2129_v63 = vpop.permute.xlu1 %2128 }
 0x5bf   : > { %v2057_v35 = vmax.f32 %v2017_v30, 0.0 }
 0x5c0   : > { %v2058_v37 = vmax.f32 %v2019_v33, 0.0 }
 0x5c1   : > { %v2075_v38 = vpack.c.bf16 %v2057_v35, %v2055_v34  ;;  %3610 = vmatmul.mubr.msk.bf16.gmra.mrb[72].mxu1 %vm923_vm1, %v3855_v1 }
 0x5c2   : > { %v2076_v39 = vpack.c.bf16 %v2058_v37, %v2056_v36  ;;  %v2022_v40 = vpop.f32.mrb[60].mxu1  ;;  %2558 = vmatprep.mubr.bf16.mxu1 %v4298_v0 }
 0x5c3   : > { %v2023_v41 = vadd.f32 %v2022_v40, %v1863_v5  ;;  %v2024_v6 = vpop.f32.mrb[61].mxu1 }
 0x5c4   : > { %v2025_v43 = vadd.f32 %v2024_v6, %v1863_v5  ;;  %v2026_v44 = vpop.f32.mrb[62].mxu1  ;;  %2251 = vmatprep.subr.bf16.mxu0 %v2076_v39  ;;  %v2134_v39 = vpop.permute.xlu0 %2133 }
 0x5c5   : > { %v2027_v45 = vadd.f32 %v2026_v44, %v1868_v42  ;;  %v2028_v46 = vpop.f32.mrb[63].mxu1  ;;  %2252 = vmatpush1.bf16.msra.mxu0 %v2075_v38  ;;  %v2059_v49 = vmax.f32 %v2023_v41, 0.0 }
 0x5c6   : > { %v2029_v47 = vadd.f32 %v2028_v46, %v1868_v42  ;;  %v2060_v9 = vmax.f32 %v2025_v43, 0.0  ;;  %v2139_v43 = vpop.permute.xlu1 %2138 }
 0x5c7   : > { %v2061_v4 = vmax.f32 %v2027_v45, 0.0 }
 0x5c8   : > { %v2062_v50 = vmax.f32 %v2029_v47, 0.0 }
 0x5c9   : > { %v2077_v51 = vpack.c.bf16 %v2061_v4, %v2059_v49  ;;  %3611 = vmatmul.mubr.msk.bf16.gmra.mrb[76].mxu1 %vm923_vm1, %v3856_v2 }
 0x5ca   : > { %v2078_v10 = vpack.c.bf16 %v2062_v50, %v2060_v9  ;;  %2568 = vmatprep.mubr.bf16.mxu1 %v4298_v0 }
 0x5cc   : > { %2253 = vmatprep.subr.bf16.mxu0 %v2078_v10 }
 0x5cd   : > { %2254 = vmatpush1.bf16.msra.mxu0 %v2077_v51 }
 0x5d0   : > { %2272 = vmatmul.mubr.bf16.vlgmr.msra.gmra.mrb[64].mxu0 %v3845_v48  ;;  %v2144_v48 = vpop.permute.xlu0 %2143 }
 0x5d1   : > { %2281 = vmatprep.mubr.bf16.mxu0 %v4298_v0  ;;  %3612 = vmatmul.mubr.msk.bf16.gmra.mrb[80].mxu1 %vm923_vm1, %v3857_v3 }
 0x5d2   : > { %2578 = vmatprep.mubr.bf16.mxu1 %v4298_v0 }
 0x5d8   : > { %2282 = vmatmul.mubr.bf16.gmra.mrb[68].mxu0 %v3846_v52 }
 0x5d9   : > { %2291 = vmatprep.mubr.bf16.mxu0 %v4298_v0  ;;  %3613 = vmatmul.mubr.msk.bf16.gmra.mrb[84].mxu1 %vm923_vm1, %v3858_v7 }
 0x5da   : > { %2588 = vmatprep.mubr.bf16.mxu1 %v4298_v0 }
 0x5e0   : > { %2292 = vmatmul.mubr.bf16.gmra.mrb[72].mxu0 %v3847_v54 }
 0x5e1   : > { %2301 = vmatprep.mubr.bf16.mxu0 %v4298_v0  ;;  %3614 = vmatmul.mubr.msk.bf16.gmra.mrb[88].mxu1 %vm923_vm1, %v3859_v17 }
 0x5e2   : > { %2598 = vmatprep.mubr.bf16.mxu1 %v4298_v0 }
 0x5e8   : > { %2302 = vmatmul.mubr.bf16.gmra.mrb[76].mxu0 %v3848_v12 }
 0x5e9   : > { %2311 = vmatprep.mubr.bf16.mxu0 %v4298_v0  ;;  %3615 = vmatmul.mubr.msk.bf16.gmra.mrb[92].mxu1 %vm923_vm1, %v3860_v8 }
 0x5ea   : > { %2689 = vmatprep.mubr.bf16.mxu1 %v4298_v0 }
 0x5f0   : > { %2312 = vmatmul.mubr.bf16.gmra.mrb[80].mxu0 %v3849_v55 }
 0x5f1   : > { %2321 = vmatprep.mubr.bf16.mxu0 %v4298_v0 }
 0x5f8   : > { %2322 = vmatmul.mubr.bf16.gmra.mrb[84].mxu0 %v3850_v53  ;;  %v2149_v53 = vpop.permute.xlu1 %2148 }
 0x5f9   : > { %2331 = vmatprep.mubr.bf16.mxu0 %v4298_v0 }
 0x600   : > { %2332 = vmatmul.mubr.bf16.gmra.mrb[88].mxu0 %v3851_v56 }
 0x601   : > { %2341 = vmatprep.mubr.bf16.mxu0 %v4298_v0 }
 0x608   : > { %2342 = vmatmul.mubr.bf16.gmra.mrb[92].mxu0 %v3852_v59 }
 0x609   : > { %3138 = vmatprep.mubr.bf16.mxu0 %v4298_v0 }
 0x6a3   : > { %v2273_v11 = vpop.f32.mrb[64].mxu0 }
 0x6a4   : > { %v2274_v13 = vadd.f32 %v2273_v11, %v2114_v57  ;;  %v2275_v20 = vpop.f32.mrb[65].mxu0 }
 0x6a5   : > { %v2276_v58 = vadd.f32 %v2275_v20, %v2114_v57  ;;  %v2277_v15 = vpop.f32.mrb[66].mxu0  ;;  %v2154_v57 = vpop.permute.xlu0 %2153 }
 0x6a6   : > { %v2278_v16 = vadd.f32 %v2277_v15, %v2119_v14  ;;  %v2279_v18 = vpop.f32.mrb[67].mxu0  ;;  %v2352_v21 = vmax.f32 %v2274_v13, 0.0 }
 0x6a7   : > { %v2280_v19 = vadd.f32 %v2279_v18, %v2119_v14  ;;  %v2353_v22 = vmax.f32 %v2276_v58, 0.0  ;;  %v2159_v58 = vpop.permute.xlu1 %2158 }
 0x6a8   : > { %v2354_v31 = vmax.f32 %v2278_v16, 0.0 }
 0x6a9   : > { %v2355_v23 = vmax.f32 %v2280_v19, 0.0 }
 0x6aa   : > { %v2384_v24 = vpack.c.bf16 %v2354_v31, %v2352_v21 }
 0x6ab   : > { %v2385_v61 = vpack.c.bf16 %v2355_v23, %v2353_v22  ;;  %v2283_v26 = vpop.f32.mrb[68].mxu0 }
 0x6ac   : > { %v2284_v27 = vadd.f32 %v2283_v26, %v2124_v25  ;;  %v2285_v28 = vpop.f32.mrb[69].mxu0 }
 0x6ad   : > { %v2286_v29 = vadd.f32 %v2285_v28, %v2124_v25  ;;  %v2287_v30 = vpop.f32.mrb[70].mxu0  ;;  %2657 = vmatprep.subr.bf16.mxu1 %v2385_v61  ;;  %v2164_v61 = vpop.permute.xlu0 %2163 }
 0x6ae   : > { %v2288_v32 = vadd.f32 %v2287_v30, %v2129_v63  ;;  %v2289_v33 = vpop.f32.mrb[71].mxu0  ;;  %2658 = vmatpush1.bf16.msra.mxu1 %v2384_v24  ;;  %v2356_v35 = vmax.f32 %v2284_v27, 0.0 }
 0x6af   : > { %v2290_v34 = vadd.f32 %v2289_v33, %v2129_v63  ;;  %v2357_v37 = vmax.f32 %v2286_v29, 0.0  ;;  %v2169_v29 = vpop.permute.xlu1 %2168 }
 0x6b0   : > { %v2358_v36 = vmax.f32 %v2288_v32, 0.0 }
 0x6b1   : > { %v2359_v38 = vmax.f32 %v2290_v34, 0.0 }
 0x6b2   : > { %v2386_v5 = vpack.c.bf16 %v2358_v36, %v2356_v35 }
 0x6b3   : > { %v2387_v40 = vpack.c.bf16 %v2359_v38, %v2357_v37  ;;  %v2293_v41 = vpop.f32.mrb[72].mxu0 }
 0x6b4   : > { %v2294_v6 = vadd.f32 %v2293_v41, %v2134_v39  ;;  %v2295_v42 = vpop.f32.mrb[73].mxu0 }
 0x6b5   : > { %v2296_v44 = vadd.f32 %v2295_v42, %v2134_v39  ;;  %v2297_v45 = vpop.f32.mrb[74].mxu0  ;;  %2659 = vmatprep.subr.bf16.mxu1 %v2387_v40  ;;  %v2174_v40 = vpop.permute.xlu0 %2173 }
 0x6b6   : > { %v2298_v46 = vadd.f32 %v2297_v45, %v2139_v43  ;;  %v2299_v47 = vpop.f32.mrb[75].mxu0  ;;  %2660 = vmatpush1.bf16.msra.mxu1 %v2386_v5  ;;  %v2360_v4 = vmax.f32 %v2294_v6, 0.0 }
 0x6b7   : > { %v2300_v49 = vadd.f32 %v2299_v47, %v2139_v43  ;;  %v2361_v50 = vmax.f32 %v2296_v44, 0.0  ;;  %v2179_v44 = vpop.permute.xlu1 %2178 }
 0x6b8   : > { %v2362_v9 = vmax.f32 %v2298_v46, 0.0 }
 0x6b9   : > { %v2363_v51 = vmax.f32 %v2300_v49, 0.0 }
 0x6ba   : > { %v2388_v10 = vpack.c.bf16 %v2362_v9, %v2360_v4 }
 0x6bb   : > { %v2389_v52 = vpack.c.bf16 %v2363_v51, %v2361_v50  ;;  %v2303_v54 = vpop.f32.mrb[76].mxu0 }
 0x6bc   : > { %v2304_v12 = vadd.f32 %v2303_v54, %v2144_v48  ;;  %v2305_v55 = vpop.f32.mrb[77].mxu0 }
 0x6bd   : > { %v2306_v56 = vadd.f32 %v2305_v55, %v2144_v48  ;;  %v2307_v59 = vpop.f32.mrb[78].mxu0  ;;  %2661 = vmatprep.subr.bf16.mxu1 %v2389_v52  ;;  %v2184_v52 = vpop.permute.xlu0 %2183 }
 0x6be   : > { %v2308_v60 = vadd.f32 %v2307_v59, %v2149_v53  ;;  %v2309_v62 = vpop.f32.mrb[79].mxu0  ;;  %2662 = vmatpush1.bf16.msra.mxu1 %v2388_v10  ;;  %v2364_v2 = vmax.f32 %v2304_v12, 0.0 }
 0x6bf   : > { %v2310_v1 = vadd.f32 %v2309_v62, %v2149_v53  ;;  %v2365_v7 = vmax.f32 %v2306_v56, 0.0  ;;  %v2189_v56 = vpop.permute.xlu1 %2188 }
 0x6c0   : > { %v2366_v3 = vmax.f32 %v2308_v60, 0.0 }
 0x6c1   : > { %v2367_v17 = vmax.f32 %v2310_v1, 0.0 }
 0x6c2   : > { %v2390_v8 = vpack.c.bf16 %v2366_v3, %v2364_v2 }
 0x6c3   : > { %v2391_v11 = vpack.c.bf16 %v2367_v17, %v2365_v7  ;;  %v2313_v13 = vpop.f32.mrb[80].mxu0 }
 0x6c4   : > { %v2314_v20 = vadd.f32 %v2313_v13, %v2154_v57  ;;  %v2315_v14 = vpop.f32.mrb[81].mxu0  ;;  %v3861_v13 = vld [vmem:[#allocation18] sm:$0xff]  }
 0x6c5   : > { %v2316_v15 = vadd.f32 %v2315_v14, %v2154_v57  ;;  %v2317_v16 = vpop.f32.mrb[82].mxu0  ;;  %2663 = vmatprep.subr.bf16.mxu1 %v2391_v11  ;;  %v3863_v14 = vld [vmem:[#allocation18 + $0x10] sm:$0xff]  }
 0x6c6   : > { %v2318_v18 = vadd.f32 %v2317_v16, %v2159_v58  ;;  %v2319_v19 = vpop.f32.mrb[83].mxu0  ;;  %2664 = vmatpush1.bf16.msra.mxu1 %v2390_v8  ;;  %v2368_v31 = vmax.f32 %v2314_v20, 0.0  ;;  %v3862_v20 = vld [vmem:[#allocation18 + $0x8] sm:$0xff]  }
 0x6c7   : > { %v2320_v21 = vadd.f32 %v2319_v19, %v2159_v58  ;;  %v2369_v23 = vmax.f32 %v2316_v15, 0.0  ;;  %v3864_v58 = vld [vmem:[#allocation18 + $0x18] sm:$0xff]   ;;  %v3865_v15 = vld [vmem:[#allocation18 + $0x20] sm:$0xff]   ;;  %v3866_v16 = vld [vmem:[#allocation18 + $0x28] sm:$0xff]  }
 0x6c8   : > { %v2370_v22 = vmax.f32 %v2318_v18, 0.0  ;;  %v3867_v18 = vld [vmem:[#allocation18 + $0x30] sm:$0xff]   ;;  %v3868_v19 = vld [vmem:[#allocation18 + $0x38] sm:$0xff]  }
 0x6c9   : > { %v2371_v24 = vmax.f32 %v2320_v21, 0.0  ;;  %v2789_v21 = vpop.permute.xlu0 %2788 }
 0x6ca   : > { %v2392_v25 = vpack.c.bf16 %v2370_v22, %v2368_v31 }
 0x6cb   : > { %v2393_v26 = vpack.c.bf16 %v2371_v24, %v2369_v23  ;;  %v2323_v27 = vpop.f32.mrb[84].mxu0  ;;  %v2794_v24 = vpop.permute.xlu1 %2793 }
 0x6cc   : > { %v2324_v28 = vadd.f32 %v2323_v27, %v2164_v61  ;;  %v2325_v63 = vpop.f32.mrb[85].mxu0 }
 0x6cd   : > { %v2326_v30 = vadd.f32 %v2325_v63, %v2164_v61  ;;  %v2327_v32 = vpop.f32.mrb[86].mxu0  ;;  %2665 = vmatprep.subr.bf16.mxu1 %v2393_v26 }
 0x6ce   : > { %v2328_v33 = vadd.f32 %v2327_v32, %v2169_v29  ;;  %v2329_v34 = vpop.f32.mrb[87].mxu0  ;;  %2666 = vmatpush1.bf16.msra.mxu1 %v2392_v25  ;;  %v2372_v36 = vmax.f32 %v2324_v28, 0.0 }
 0x6cf   : > { %v2330_v35 = vadd.f32 %v2329_v34, %v2169_v29  ;;  %v2373_v38 = vmax.f32 %v2326_v30, 0.0  ;;  %v2799_v34 = vpop.permute.xlu0 %2798 }
 0x6d0   : > { %v2374_v37 = vmax.f32 %v2328_v33, 0.0 }
 0x6d1   : > { %v2375_v5 = vmax.f32 %v2330_v35, 0.0 }
 0x6d2   : > { %v2394_v39 = vpack.c.bf16 %v2374_v37, %v2372_v36 }
 0x6d3   : > { %v2395_v41 = vpack.c.bf16 %v2375_v5, %v2373_v38  ;;  %v2333_v6 = vpop.f32.mrb[88].mxu0  ;;  %v2804_v5 = vpop.permute.xlu1 %2803 }
 0x6d4   : > { %v2334_v42 = vadd.f32 %v2333_v6, %v2174_v40  ;;  %v2335_v43 = vpop.f32.mrb[89].mxu0 }
 0x6d5   : > { %v2336_v45 = vadd.f32 %v2335_v43, %v2174_v40  ;;  %v2337_v46 = vpop.f32.mrb[90].mxu0  ;;  %2667 = vmatprep.subr.bf16.mxu1 %v2395_v41 }
 0x6d6   : > { %v2338_v47 = vadd.f32 %v2337_v46, %v2179_v44  ;;  %v2339_v49 = vpop.f32.mrb[91].mxu0  ;;  %2668 = vmatpush1.bf16.msra.mxu1 %v2394_v39  ;;  %v2376_v9 = vmax.f32 %v2334_v42, 0.0 }
 0x6d7   : > { %v2340_v4 = vadd.f32 %v2339_v49, %v2179_v44  ;;  %v2377_v51 = vmax.f32 %v2336_v45, 0.0  ;;  %v2809_v49 = vpop.permute.xlu0 %2808 }
 0x6d8   : > { %v2378_v50 = vmax.f32 %v2338_v47, 0.0 }
 0x6d9   : > { %v2379_v10 = vmax.f32 %v2340_v4, 0.0 }
 0x6da   : > { %v2396_v48 = vpack.c.bf16 %v2378_v50, %v2376_v9 }
 0x6db   : > { %v2397_v54 = vpack.c.bf16 %v2379_v10, %v2377_v51  ;;  %v2343_v12 = vpop.f32.mrb[92].mxu0  ;;  %v2814_v10 = vpop.permute.xlu1 %2813 }
 0x6dc   : > { %v2344_v55 = vadd.f32 %v2343_v12, %v2184_v52  ;;  %v2345_v53 = vpop.f32.mrb[93].mxu0 }
 0x6dd   : > { %v2346_v59 = vadd.f32 %v2345_v53, %v2184_v52  ;;  %v2347_v60 = vpop.f32.mrb[94].mxu0  ;;  %2669 = vmatprep.subr.bf16.mxu1 %v2397_v54 }
 0x6de   : > { %v2348_v62 = vadd.f32 %v2347_v60, %v2189_v56  ;;  %v2349_v1 = vpop.f32.mrb[95].mxu0  ;;  %2670 = vmatpush1.bf16.msra.mxu1 %v2396_v48  ;;  %v2380_v3 = vmax.f32 %v2344_v55, 0.0 }
 0x6df   : > { %v2350_v2 = vadd.f32 %v2349_v1, %v2189_v56  ;;  %v2381_v17 = vmax.f32 %v2346_v59, 0.0  ;;  %v2819_v1 = vpop.permute.xlu0 %2818 }
 0x6e0   : > { %v2382_v7 = vmax.f32 %v2348_v62, 0.0 }
 0x6e1   : > { %v2383_v8 = vmax.f32 %v2350_v2, 0.0 }
 0x6e2   : > { %v2398_v57 = vpack.c.bf16 %v2382_v7, %v2380_v3 }
 0x6e3   : > { %v2399_v11 = vpack.c.bf16 %v2383_v8, %v2381_v17  ;;  %v2824_v8 = vpop.permute.xlu1 %2823 }
 0x6e5   : > { %2671 = vmatprep.subr.bf16.mxu1 %v2399_v11 }
 0x6e6   : > { %2672 = vmatpush1.bf16.msra.mxu1 %v2398_v57 }
 0x6e9   : > { %2690 = vmatmul.mubr.bf16.vlgmr.msra.gmra.mrb[64].mxu1 %v3861_v13 }
 0x6ea   : > { %2699 = vmatprep.mubr.bf16.mxu1 %v4298_v0 }
 0x6f1   : > { %2700 = vmatmul.mubr.bf16.gmra.mrb[68].mxu1 %v3862_v20 }
 0x6f2   : > { %2709 = vmatprep.mubr.bf16.mxu1 %v4298_v0 }
 0x6f9   : > { %2710 = vmatmul.mubr.bf16.gmra.mrb[72].mxu1 %v3863_v14 }
 0x6fa   : > { %2719 = vmatprep.mubr.bf16.mxu1 %v4298_v0 }
 0x701   : > { %2720 = vmatmul.mubr.bf16.gmra.mrb[76].mxu1 %v3864_v58 }
 0x702   : > { %2729 = vmatprep.mubr.bf16.mxu1 %v4298_v0 }
 0x709   : > { %2730 = vmatmul.mubr.bf16.gmra.mrb[80].mxu1 %v3865_v15 }
 0x70a   : > { %2739 = vmatprep.mubr.bf16.mxu1 %v4298_v0 }
 0x711   : > { %2740 = vmatmul.mubr.bf16.gmra.mrb[84].mxu1 %v3866_v16 }
 0x712   : > { %2749 = vmatprep.mubr.bf16.mxu1 %v4298_v0 }
 0x719   : > { %2750 = vmatmul.mubr.bf16.gmra.mrb[88].mxu1 %v3867_v18 }
 0x71a   : > { %2759 = vmatprep.mubr.bf16.mxu1 %v4298_v0 }
 0x721   : > { %2760 = vmatmul.mubr.bf16.gmra.mrb[92].mxu1 %v3868_v19 }
 0x7bc   : > { %v2691_v31 = vpop.f32.mrb[64].mxu1 }
 0x7bd   : > { %v2866_v22 = vadd.f32 %v2789_v21, %v2691_v31  ;;  %v2693_v23 = vpop.f32.mrb[65].mxu1 }
 0x7be   : > { %v2867_v25 = vadd.f32 %v2789_v21, %v2693_v23  ;;  %v2695_v61 = vpop.f32.mrb[66].mxu1  ;;  %v2829_v21 = vpop.permute.xlu0 %2828 }
 0x7bf   : > { %v2868_v26 = vadd.f32 %v2794_v24, %v2695_v61  ;;  %v2697_v27 = vpop.f32.mrb[67].mxu1  ;;  %v2898_v63 = vmax.f32 %v2866_v22, 0.0 }
 0x7c0   : > { %v2869_v28 = vadd.f32 %v2794_v24, %v2697_v27  ;;  %v2899_v30 = vmax.f32 %v2867_v25, 0.0  ;;  %v2834_v25 = vpop.permute.xlu1 %2833 }
 0x7c1   : > { %v2900_v29 = vmax.f32 %v2868_v26, 0.0 }
 0x7c2   : > { %v2901_v32 = vmax.f32 %v2869_v28, 0.0 }
 0x7c3   : > { %v2930_v33 = vpack.c.bf16 %v2900_v29, %v2898_v63 }
 0x7c4   : > { %v2931_v35 = vpack.c.bf16 %v2901_v32, %v2899_v30  ;;  %v2701_v36 = vpop.f32.mrb[68].mxu1 }
 0x7c5   : > { %v2870_v37 = vadd.f32 %v2799_v34, %v2701_v36  ;;  %v2703_v38 = vpop.f32.mrb[69].mxu1 }
 0x7c6   : > { %v2871_v39 = vadd.f32 %v2799_v34, %v2703_v38  ;;  %v2705_v40 = vpop.f32.mrb[70].mxu1  ;;  %3106 = vmatprep.subr.bf16.mxu0 %v2931_v35  ;;  %v2839_v35 = vpop.permute.xlu0 %2838 }
 0x7c7   : > { %v2872_v41 = vadd.f32 %v2804_v5, %v2705_v40  ;;  %v2707_v6 = vpop.f32.mrb[71].mxu1  ;;  %3107 = vmatpush1.bf16.msra.mxu0 %v2930_v33  ;;  %v2902_v43 = vmax.f32 %v2870_v37, 0.0 }
 0x7c8   : > { %v2873_v42 = vadd.f32 %v2804_v5, %v2707_v6  ;;  %v2903_v45 = vmax.f32 %v2871_v39, 0.0  ;;  %v2844_v39 = vpop.permute.xlu1 %2843 }
 0x7c9   : > { %v2904_v44 = vmax.f32 %v2872_v41, 0.0 }
 0x7ca   : > { %v2905_v46 = vmax.f32 %v2873_v42, 0.0 }
 0x7cb   : > { %v2932_v47 = vpack.c.bf16 %v2904_v44, %v2902_v43 }
 0x7cc   : > { %v2933_v4 = vpack.c.bf16 %v2905_v46, %v2903_v45  ;;  %v2711_v9 = vpop.f32.mrb[72].mxu1 }
 0x7cd   : > { %v2874_v50 = vadd.f32 %v2809_v49, %v2711_v9  ;;  %v2713_v51 = vpop.f32.mrb[73].mxu1 }
 0x7ce   : > { %v2875_v48 = vadd.f32 %v2809_v49, %v2713_v51  ;;  %v2715_v52 = vpop.f32.mrb[74].mxu1  ;;  %3108 = vmatprep.subr.bf16.mxu0 %v2933_v4  ;;  %v2849_v4 = vpop.permute.xlu0 %2848 }
 0x7cf   : > { %v2876_v54 = vadd.f32 %v2814_v10, %v2715_v52  ;;  %v2717_v12 = vpop.f32.mrb[75].mxu1  ;;  %3109 = vmatpush1.bf16.msra.mxu0 %v2932_v47  ;;  %v2906_v53 = vmax.f32 %v2874_v50, 0.0 }
 0x7d0   : > { %v2877_v55 = vadd.f32 %v2814_v10, %v2717_v12  ;;  %v2907_v59 = vmax.f32 %v2875_v48, 0.0  ;;  %v2854_v48 = vpop.permute.xlu1 %2853 }
 0x7d1   : > { %v2908_v56 = vmax.f32 %v2876_v54, 0.0 }
 0x7d2   : > { %v2909_v60 = vmax.f32 %v2877_v55, 0.0 }
 0x7d3   : > { %v2934_v62 = vpack.c.bf16 %v2908_v56, %v2906_v53 }
 0x7d4   : > { %v2935_v2 = vpack.c.bf16 %v2909_v60, %v2907_v59  ;;  %v2721_v3 = vpop.f32.mrb[76].mxu1 }
 0x7d5   : > { %v2878_v7 = vadd.f32 %v2819_v1, %v2721_v3  ;;  %v2723_v17 = vpop.f32.mrb[77].mxu1 }
 0x7d6   : > { %v2879_v57 = vadd.f32 %v2819_v1, %v2723_v17  ;;  %v2725_v11 = vpop.f32.mrb[78].mxu1  ;;  %3110 = vmatprep.subr.bf16.mxu0 %v2935_v2  ;;  %v2859_v2 = vpop.permute.xlu0 %2858 }
 0x7d7   : > { %v2880_v13 = vadd.f32 %v2824_v8, %v2725_v11  ;;  %v2727_v20 = vpop.f32.mrb[79].mxu1  ;;  %3111 = vmatpush1.bf16.msra.mxu0 %v2934_v62  ;;  %v2910_v58 = vmax.f32 %v2878_v7, 0.0 }
 0x7d8   : > { %v2881_v14 = vadd.f32 %v2824_v8, %v2727_v20  ;;  %v2911_v16 = vmax.f32 %v2879_v57, 0.0  ;;  %v2864_v57 = vpop.permute.xlu1 %2863 }
 0x7d9   : > { %v2912_v15 = vmax.f32 %v2880_v13, 0.0 }
 0x7da   : > { %v2913_v18 = vmax.f32 %v2881_v14, 0.0 }
 0x7db   : > { %v2936_v19 = vpack.c.bf16 %v2912_v15, %v2910_v58 }
 0x7dc   : > { %v2937_v31 = vpack.c.bf16 %v2913_v18, %v2911_v16  ;;  %v2731_v22 = vpop.f32.mrb[80].mxu1 }
 0x7dd   : > { %v2882_v23 = vadd.f32 %v2829_v21, %v2731_v22  ;;  %v2733_v24 = vpop.f32.mrb[81].mxu1  ;;  %v3869_v22 = vld [vmem:[%s5044_s24] sm:$0xff]  }
 0x7de   : > { %v2883_v61 = vadd.f32 %v2829_v21, %v2733_v24  ;;  %v2735_v26 = vpop.f32.mrb[82].mxu1  ;;  %3112 = vmatprep.subr.bf16.mxu0 %v2937_v31  ;;  %v3871_v24 = vld [vmem:[%s5044_s24 + $0x10] sm:$0xff]  }
 0x7df   : > { %v2884_v27 = vadd.f32 %v2834_v25, %v2735_v26  ;;  %v2737_v28 = vpop.f32.mrb[83].mxu1  ;;  %3113 = vmatpush1.bf16.msra.mxu0 %v2936_v19  ;;  %v2914_v29 = vmax.f32 %v2882_v23, 0.0  ;;  %v3870_v23 = vld [vmem:[%s5044_s24 + $0x8] sm:$0xff]  }
 0x7e0   : > { %v2885_v63 = vadd.f32 %v2834_v25, %v2737_v28  ;;  %v2915_v32 = vmax.f32 %v2883_v61, 0.0  ;;  %v3872_v25 = vld [vmem:[%s5044_s24 + $0x18] sm:$0xff]   ;;  %v3873_v61 = vld [vmem:[%s5044_s24 + $0x20] sm:$0xff]   ;;  %v3874_v26 = vld [vmem:[%s5044_s24 + $0x28] sm:$0xff]  }
 0x7e1   : > { %v2916_v30 = vmax.f32 %v2884_v27, 0.0  ;;  %v3875_v27 = vld [vmem:[%s5044_s24 + $0x30] sm:$0xff]   ;;  %v3876_v28 = vld [vmem:[%s5044_s24 + $0x38] sm:$0xff]  }
 0x7e2   : > { %v2917_v33 = vmax.f32 %v2885_v63, 0.0  ;;  %v2981_v63 = vpop.permute.xlu0 %2980 }
 0x7e3   : > { %v2938_v34 = vpack.c.bf16 %v2916_v30, %v2914_v29 }
 0x7e4   : > { %v2939_v36 = vpack.c.bf16 %v2917_v33, %v2915_v32  ;;  %v2741_v37 = vpop.f32.mrb[84].mxu1  ;;  %v2986_v33 = vpop.permute.xlu1 %2985 }
 0x7e5   : > { %v2886_v38 = vadd.f32 %v2839_v35, %v2741_v37  ;;  %v2743_v5 = vpop.f32.mrb[85].mxu1 }
 0x7e6   : > { %v2887_v40 = vadd.f32 %v2839_v35, %v2743_v5  ;;  %v2745_v41 = vpop.f32.mrb[86].mxu1  ;;  %3114 = vmatprep.subr.bf16.mxu0 %v2939_v36 }
 0x7e7   : > { %v2888_v6 = vadd.f32 %v2844_v39, %v2745_v41  ;;  %v2747_v42 = vpop.f32.mrb[87].mxu1  ;;  %3115 = vmatpush1.bf16.msra.mxu0 %v2938_v34  ;;  %v2918_v44 = vmax.f32 %v2886_v38, 0.0 }
 0x7e8   : > { %v2889_v43 = vadd.f32 %v2844_v39, %v2747_v42  ;;  %v2919_v46 = vmax.f32 %v2887_v40, 0.0  ;;  %v2991_v42 = vpop.permute.xlu0 %2990 }
 0x7e9   : > { %v2920_v45 = vmax.f32 %v2888_v6, 0.0 }
 0x7ea   : > { %v2921_v47 = vmax.f32 %v2889_v43, 0.0 }
 0x7eb   : > { %v2940_v49 = vpack.c.bf16 %v2920_v45, %v2918_v44 }
 0x7ec   : > { %v2941_v9 = vpack.c.bf16 %v2921_v47, %v2919_v46  ;;  %v2751_v50 = vpop.f32.mrb[88].mxu1  ;;  %v2996_v46 = vpop.permute.xlu1 %2995 }
 0x7ed   : > { %v2890_v51 = vadd.f32 %v2849_v4, %v2751_v50  ;;  %v2753_v10 = vpop.f32.mrb[89].mxu1 }
 0x7ee   : > { %v2891_v52 = vadd.f32 %v2849_v4, %v2753_v10  ;;  %v2755_v54 = vpop.f32.mrb[90].mxu1  ;;  %3116 = vmatprep.subr.bf16.mxu0 %v2941_v9 }
 0x7ef   : > { %v2892_v12 = vadd.f32 %v2854_v48, %v2755_v54  ;;  %v2757_v55 = vpop.f32.mrb[91].mxu1  ;;  %3117 = vmatpush1.bf16.msra.mxu0 %v2940_v49  ;;  %v2922_v56 = vmax.f32 %v2890_v51, 0.0 }
 0x7f0   : > { %v2893_v53 = vadd.f32 %v2854_v48, %v2757_v55  ;;  %v2923_v60 = vmax.f32 %v2891_v52, 0.0 }
 0x7f1   : > { %v2924_v59 = vmax.f32 %v2892_v12, 0.0  ;;  %v3001_v12 = vpop.permute.xlu0 %3000 }
 0x7f2   : > { %v2925_v62 = vmax.f32 %v2893_v53, 0.0 }
 0x7f3   : > { %v2942_v1 = vpack.c.bf16 %v2924_v59, %v2922_v56 }
 0x7f4   : > { %v2943_v3 = vpack.c.bf16 %v2925_v62, %v2923_v60  ;;  %v2761_v7 = vpop.f32.mrb[92].mxu1  ;;  %v3006_v60 = vpop.permute.xlu1 %3005 }
 0x7f5   : > { %v2894_v17 = vadd.f32 %v2859_v2, %v2761_v7  ;;  %v2763_v8 = vpop.f32.mrb[93].mxu1 }
 0x7f6   : > { %v2895_v11 = vadd.f32 %v2859_v2, %v2763_v8  ;;  %v2765_v13 = vpop.f32.mrb[94].mxu1  ;;  %3118 = vmatprep.subr.bf16.mxu0 %v2943_v3 }
 0x7f7   : > { %v2896_v20 = vadd.f32 %v2864_v57, %v2765_v13  ;;  %v2767_v14 = vpop.f32.mrb[95].mxu1  ;;  %3119 = vmatpush1.bf16.msra.mxu0 %v2942_v1  ;;  %v2926_v15 = vmax.f32 %v2894_v17, 0.0 }
 0x7f8   : > { %v2897_v58 = vadd.f32 %v2864_v57, %v2767_v14  ;;  %v2927_v18 = vmax.f32 %v2895_v11, 0.0 }
 0x7f9   : > { %v2928_v16 = vmax.f32 %v2896_v20, 0.0  ;;  %v3011_v20 = vpop.permute.xlu0 %3010 }
 0x7fa   : > { %v2929_v19 = vmax.f32 %v2897_v58, 0.0 }
 0x7fb   : > { %v2944_v21 = vpack.c.bf16 %v2928_v16, %v2926_v15 }
 0x7fc   : > { %v2945_v31 = vpack.c.bf16 %v2929_v19, %v2927_v18  ;;  %v3016_v18 = vpop.permute.xlu1 %3015 }
 0x7fe   : > { %3120 = vmatprep.subr.bf16.mxu0 %v2945_v31 }
 0x7ff   : > { %3121 = vmatpush1.bf16.msra.mxu0 %v2944_v21 }
 0x802   : > { %3139 = vmatmul.mubr.bf16.vlgmr.msra.gmra.mrb[96].mxu0 %v3869_v22 }
 0x803   : > { %3148 = vmatprep.mubr.bf16.mxu0 %v4298_v0 }
 0x80a   : > { %3149 = vmatmul.mubr.bf16.gmra.mrb[100].mxu0 %v3870_v23 }
 0x80b   : > { %3158 = vmatprep.mubr.bf16.mxu0 %v4298_v0 }
 0x812   : > { %3159 = vmatmul.mubr.bf16.gmra.mrb[104].mxu0 %v3871_v24 }
 0x813   : > { %3168 = vmatprep.mubr.bf16.mxu0 %v4298_v0 }
 0x81a   : > { %3169 = vmatmul.mubr.bf16.gmra.mrb[108].mxu0 %v3872_v25 }
 0x81b   : > { %3178 = vmatprep.mubr.bf16.mxu0 %v4298_v0 }
 0x822   : > { %3179 = vmatmul.mubr.bf16.gmra.mrb[112].mxu0 %v3873_v61 }
 0x823   : > { %3188 = vmatprep.mubr.bf16.mxu0 %v4298_v0 }
 0x82a   : > { %3189 = vmatmul.mubr.bf16.gmra.mrb[116].mxu0 %v3874_v26 }
 0x82b   : > { %3198 = vmatprep.mubr.bf16.mxu0 %v4298_v0 }
 0x832   : > { %3199 = vmatmul.mubr.bf16.gmra.mrb[120].mxu0 %v3875_v27 }
 0x833   : > { %3208 = vmatprep.mubr.bf16.mxu0 %v4298_v0 }
 0x83a   : > { %3209 = vmatmul.mubr.bf16.gmra.mrb[124].mxu0 %v3876_v28  ;;  %v3021_v28 = vpop.permute.xlu0 %3020 }
 0x83b   : > { %3306 = vmatprep.mubr.bf16.mxu0 %v4298_v0 }
 0x8d5   : > { %v3140_v29 = vpop.f32.mrb[96].mxu0 }
 0x8d6   : > { %v3141_v30 = vadd.f32 %v3140_v29, %v2981_v63  ;;  %v3142_v32 = vpop.f32.mrb[97].mxu0 }
 0x8d7   : > { %v3143_v34 = vadd.f32 %v3142_v32, %v2981_v63  ;;  %v3144_v35 = vpop.f32.mrb[98].mxu0 }
 0x8d8   : > { %v3145_v36 = vadd.f32 %v3144_v35, %v2986_v33  ;;  %v3146_v37 = vpop.f32.mrb[99].mxu0  ;;  %v3219_v5 = vmax.f32 %v3141_v30, 0.0 }
 0x8d9   : > { %v3147_v38 = vadd.f32 %v3146_v37, %v2986_v33  ;;  %v3220_v40 = vmax.f32 %v3143_v34, 0.0  ;;  %v3026_v33 = vpop.permute.xlu1 %3025 }
 0x8da   : > { %v3221_v39 = vmax.f32 %v3145_v36, 0.0 }
 0x8db   : > { %v3222_v41 = vmax.f32 %v3147_v38, 0.0 }
 0x8dc   : > { %v3251_v6 = vpack.c.bf16 %v3221_v39, %v3219_v5 }
 0x8dd   : > { %v3252_v43 = vpack.c.bf16 %v3222_v41, %v3220_v40  ;;  %v3150_v44 = vpop.f32.mrb[100].mxu0 }
 0x8de   : > { %v3151_v45 = vadd.f32 %v3150_v44, %v2991_v42  ;;  %v3152_v0 = vpop.f32.mrb[101].mxu0 }
 0x8df   : > { %v3153_v47 = vadd.f32 %v3152_v0, %v2991_v42  ;;  %v3154_v49 = vpop.f32.mrb[102].mxu0  ;;  %3274 = vmatprep.subr.bf16.mxu0 %v3252_v43  ;;  %v3031_v42 = vpop.permute.xlu0 %3030 }
 0x8e0   : > { %v3155_v4 = vadd.f32 %v3154_v49, %v2996_v46  ;;  %v3156_v9 = vpop.f32.mrb[103].mxu0  ;;  %3275 = vmatpush1.bf16.msra.mxu0 %v3251_v6  ;;  %v3223_v51 = vmax.f32 %v3151_v45, 0.0 }
 0x8e1   : > { %v3157_v50 = vadd.f32 %v3156_v9, %v2996_v46  ;;  %v3224_v48 = vmax.f32 %v3153_v47, 0.0  ;;  %v3036_v46 = vpop.permute.xlu1 %3035 }
 0x8e2   : > { %v3225_v10 = vmax.f32 %v3155_v4, 0.0 }
 0x8e3   : > { %v3226_v52 = vmax.f32 %v3157_v50, 0.0 }
 0x8e4   : > { %v3253_v54 = vpack.c.bf16 %v3225_v10, %v3223_v51 }
 0x8e5   : > { %v3254_v55 = vpack.c.bf16 %v3226_v52, %v3224_v48  ;;  %v3160_v53 = vpop.f32.mrb[104].mxu0 }
 0x8e6   : > { %v3161_v56 = vadd.f32 %v3160_v53, %v3001_v12  ;;  %v3162_v59 = vpop.f32.mrb[105].mxu0 }
 0x8e7   : > { %v3163_v62 = vadd.f32 %v3162_v59, %v3001_v12  ;;  %v3164_v1 = vpop.f32.mrb[106].mxu0  ;;  %3276 = vmatprep.subr.bf16.mxu0 %v3254_v55  ;;  %v3041_v12 = vpop.permute.xlu0 %3040 }
 0x8e8   : > { %v3165_v2 = vadd.f32 %v3164_v1, %v3006_v60  ;;  %v3166_v3 = vpop.f32.mrb[107].mxu0  ;;  %3277 = vmatpush1.bf16.msra.mxu0 %v3253_v54  ;;  %v3227_v17 = vmax.f32 %v3161_v56, 0.0 }
 0x8e9   : > { %v3167_v7 = vadd.f32 %v3166_v3, %v3006_v60  ;;  %v3228_v57 = vmax.f32 %v3163_v62, 0.0  ;;  %v3046_v60 = vpop.permute.xlu1 %3045 }
 0x8ea   : > { %v3229_v8 = vmax.f32 %v3165_v2, 0.0 }
 0x8eb   : > { %v3230_v11 = vmax.f32 %v3167_v7, 0.0 }
 0x8ec   : > { %v3255_v13 = vpack.c.bf16 %v3229_v8, %v3227_v17 }
 0x8ed   : > { %v3256_v14 = vpack.c.bf16 %v3230_v11, %v3228_v57  ;;  %v3170_v58 = vpop.f32.mrb[108].mxu0 }
 0x8ee   : > { %v3171_v15 = vadd.f32 %v3170_v58, %v3011_v20  ;;  %v3172_v16 = vpop.f32.mrb[109].mxu0 }
 0x8ef   : > { %v3173_v19 = vadd.f32 %v3172_v16, %v3011_v20  ;;  %v3174_v21 = vpop.f32.mrb[110].mxu0  ;;  %3278 = vmatprep.subr.bf16.mxu0 %v3256_v14  ;;  %v3051_v20 = vpop.permute.xlu0 %3050 }
 0x8f0   : > { %v3175_v31 = vadd.f32 %v3174_v21, %v3016_v18  ;;  %v3176_v22 = vpop.f32.mrb[111].mxu0  ;;  %3279 = vmatpush1.bf16.msra.mxu0 %v3255_v13  ;;  %v3231_v24 = vmax.f32 %v3171_v15, 0.0 }
 0x8f1   : > { %v3177_v23 = vadd.f32 %v3176_v22, %v3016_v18  ;;  %v3232_v61 = vmax.f32 %v3173_v19, 0.0  ;;  %v3056_v18 = vpop.permute.xlu1 %3055 }
 0x8f2   : > { %v3233_v25 = vmax.f32 %v3175_v31, 0.0 }
 0x8f3   : > { %v3234_v26 = vmax.f32 %v3177_v23, 0.0 }
 0x8f4   : > { %v3257_v27 = vpack.c.bf16 %v3233_v25, %v3231_v24 }
 0x8f5   : > { %v3258_v63 = vpack.c.bf16 %v3234_v26, %v3232_v61  ;;  %v3180_v29 = vpop.f32.mrb[112].mxu0 }
 0x8f6   : > { %v3181_v30 = vadd.f32 %v3180_v29, %v3021_v28  ;;  %v3182_v32 = vpop.f32.mrb[113].mxu0  ;;  %v3272_v29 = vpop.permute.xlu0 %3271 }
 0x8f7   : > { %v3183_v34 = vadd.f32 %v3182_v32, %v3021_v28  ;;  %v3184_v35 = vpop.f32.mrb[114].mxu0  ;;  %3280 = vmatprep.subr.bf16.mxu0 %v3258_v63  ;;  %v3267_v63 = vld [vmem:[%s5045_s30] sm:$0xf] }
 0x8f8   : > { %v3185_v36 = vadd.f32 %v3184_v35, %v3026_v33  ;;  %v3186_v37 = vpop.f32.mrb[115].mxu0  ;;  %3281 = vmatpush1.bf16.msra.mxu0 %v3257_v27  ;;  %v3235_v5 = vmax.f32 %v3181_v30, 0.0 }
 0x8f9   : > { %v3187_v38 = vadd.f32 %v3186_v37, %v3026_v33  ;;  %v3236_v40 = vmax.f32 %v3183_v34, 0.0  ;;  %v4299_v37 = vmov 1966171168  }
 0x8fa   : > { %v3237_v39 = vmax.f32 %v3185_v36, 0.0 }
 0x8fb   : > { %v3238_v41 = vmax.f32 %v3187_v38, 0.0  ;;  %v3321_v38 = vunpack.c.l.s4 %v4299_v37 }
 0x8fc   : > { %v3259_v6 = vpack.c.bf16 %v3237_v39, %v3235_v5  ;;  %v3323_v5 = vlaneseq }
 0x8fd   : > { %v3260_v43 = vpack.c.bf16 %v3238_v41, %v3236_v40  ;;  %v3190_v44 = vpop.f32.mrb[116].mxu0  ;;  %v3322_v39 = vunpack.c.0.s8 %v3321_v38 }
 0x8fe   : > { %v3191_v45 = vadd.f32 %v3190_v44, %v3031_v42  ;;  %v3192_v0 = vpop.f32.mrb[117].mxu0  ;;  %v3324_v40 = vshrl.u32 %v3323_v5, 7  ;;  %vm3337_vm2 = vcmp.lt.s32.totalorder %v3323_v5, 256 }
 0x8ff   : > { %v3193_v47 = vadd.f32 %v3192_v0, %v3031_v42  ;;  %v3194_v49 = vpop.f32.mrb[118].mxu0  ;;  %3282 = vmatprep.subr.bf16.mxu0 %v3260_v43 }
 0x900   : > { %v3195_v4 = vadd.f32 %v3194_v49, %v3036_v46  ;;  %v3196_v9 = vpop.f32.mrb[119].mxu0  ;;  %3283 = vmatpush1.bf16.msra.mxu0 %v3259_v6  ;;  %v3239_v51 = vmax.f32 %v3191_v45, 0.0  ;;  %v3325_v6 = vsub.s32 %v3322_v39, %v3324_v40 }
 0x901   : > { %v3197_v50 = vadd.f32 %v3196_v9, %v3036_v46  ;;  %v3240_v48 = vmax.f32 %v3193_v47, 0.0 }
 0x902   : > { %v3241_v10 = vmax.f32 %v3195_v4, 0.0 }
 0x903   : > { %v3242_v52 = vmax.f32 %v3197_v50, 0.0 }
 0x904   : > { %v3261_v54 = vpack.c.bf16 %v3241_v10, %v3239_v51 }
 0x905   : > { %v3262_v55 = vpack.c.bf16 %v3242_v52, %v3240_v48  ;;  %v3200_v53 = vpop.f32.mrb[120].mxu0 }
 0x906   : > { %v3201_v56 = vadd.f32 %v3200_v53, %v3041_v12  ;;  %v3202_v59 = vpop.f32.mrb[121].mxu0 }
 0x907   : > { %v3203_v62 = vadd.f32 %v3202_v59, %v3041_v12  ;;  %v3204_v1 = vpop.f32.mrb[122].mxu0  ;;  %3284 = vmatprep.subr.bf16.mxu0 %v3262_v55 }
 0x908   : > { %v3205_v2 = vadd.f32 %v3204_v1, %v3046_v60  ;;  %v3206_v3 = vpop.f32.mrb[123].mxu0  ;;  %3285 = vmatpush1.bf16.msra.mxu0 %v3261_v54  ;;  %v3243_v17 = vmax.f32 %v3201_v56, 0.0 }
 0x909   : > { %v3207_v7 = vadd.f32 %v3206_v3, %v3046_v60  ;;  %v3244_v57 = vmax.f32 %v3203_v62, 0.0 }
 0x90a   : > { %v3245_v8 = vmax.f32 %v3205_v2, 0.0 }
 0x90b   : > { %v3246_v11 = vmax.f32 %v3207_v7, 0.0 }
 0x90c   : > { %v3263_v13 = vpack.c.bf16 %v3245_v8, %v3243_v17 }
 0x90d   : > { %v3264_v14 = vpack.c.bf16 %v3246_v11, %v3244_v57  ;;  %v3210_v58 = vpop.f32.mrb[124].mxu0 }
 0x90e   : > { %v3211_v15 = vadd.f32 %v3210_v58, %v3051_v20  ;;  %v3212_v16 = vpop.f32.mrb[125].mxu0 }
 0x90f   : > { %v3213_v19 = vadd.f32 %v3212_v16, %v3051_v20  ;;  %v3214_v21 = vpop.f32.mrb[126].mxu0  ;;  %3286 = vmatprep.subr.bf16.mxu0 %v3264_v14 }
 0x910   : > { %v3215_v31 = vadd.f32 %v3214_v21, %v3056_v18  ;;  %v3216_v22 = vpop.f32.mrb[127].mxu0  ;;  %3287 = vmatpush1.bf16.msra.mxu0 %v3263_v13  ;;  %v3247_v24 = vmax.f32 %v3211_v15, 0.0 }
 0x911   : > { %v3217_v23 = vadd.f32 %v3216_v22, %v3056_v18  ;;  %v3248_v61 = vmax.f32 %v3213_v19, 0.0 }
 0x912   : > { %v3249_v25 = vmax.f32 %v3215_v31, 0.0 }
 0x913   : > { %v3250_v26 = vmax.f32 %v3217_v23, 0.0 }
 0x914   : > { %v3265_v27 = vpack.c.bf16 %v3249_v25, %v3247_v24 }
 0x915   : > { %v3266_v28 = vpack.c.bf16 %v3250_v26, %v3248_v61 }
 0x917   : > { %3288 = vmatprep.subr.bf16.mxu0 %v3266_v28 }
 0x918   : > { %3289 = vmatpush1.bf16.msra.mxu0 %v3265_v27 }
 0x91b   : > { %3307 = vmatmul.mubr.bf16.vlgmr.msra.gmra.mrb[128].mxu0 %v3267_v63 }
 0x9ee   : > { %v3308_v30 = vpop.f32.mrb[128].mxu0 }
 0x9ef   : > { %v3309_v32 = vadd.f32 %v3308_v30, %v3272_v29  ;;  %v3310_v33 = vpop.f32.mrb[129].mxu0 }
 0x9f0   : > { %v3311_v34 = vadd.f32 %v3310_v33, %v3272_v29  ;;  %v3312_v35 = vpop.f32.mrb[130].mxu0 }
 0x9f1   : > { %3877 = vtanh.f32 %v3309_v32  ;;  %v3313_v36 = vpop.f32.mrb[131].mxu0 }
 0x9f2   : > { %3879 = vtanh.f32 %v3311_v34 }
 0x9fb   : > { %v3878_v41 = vpop.eup %3877 }
 0x9fc   : > { %v3880_v42 = vpop.eup %3879 }
 0x9fd   : > { %v3319_v43 = vcombine.low %v3878_v41, %v3880_v42 }
 0x9ff   : > { %v3326_v44 = vrot.slane %v3319_v43, %v3325_v6 }
 0xa01   : > { %v3333_v45 = vrot.slane %v3326_v44, %v3325_v6 }
 0xa03   : > { %3339 = vst.msk [vmem:[%s764_s20] sm:$0x3] %vm3337_vm2, %v3333_v45 }
 0xa04 PF: > { %s5047_s17 = sld [smem:[#allocation29_spill]] }
 0xa0a   : > { %s35_s27 = sadd.s32 1, %s5047_s17  }
 0xa0b   : > { %p32_p3 = scmp.ge.s32.totalorder %s35_s27, 6  }
 0xa0d   :  { %34 = sbr.rel (!%p32_p3) target bundleno = 16 (0x10), region = 175 }
 0xa14   :  { %3360 = vsyncpa [#allocation3], 1 }
 0xa15   :  { %3362 = vsyncpa [#allocation3 + $0x1], 1 }
 0xa16   :  { %3363 = vsyncpa [#allocation5], 1 }
 0xa17   :  { %3364 = vsyncpa [#allocation8], 1 }
 0xa18   :  { %3365 = vsyncpa [#allocation11], 1 }
 0xa19   :  { %3366 = vsyncpa [#allocation14], 1 }
 0xa1a   :  { %3367 = vsyncpa [#allocation17], 1 }
 0xa1b   :  { %3368 = vsyncpa [#allocation20], 1 }

</bundles_post_ra>
